<compile_context>
chip_gen: v7x
topology: tpu7x:2x2x1
jax: 0.10.0
libtpu: 0.0.40
codegen_flags: <defaults>
</compile_context>

<pallas_src>
import jax
import jax.numpy as jnp
from jax.experimental import pallas as pl
from jax.experimental.pallas import tpu as pltpu

HIDDEN1 = 1024
HIDDEN2 = 512


def _round_up(x, m):
    return (x + m - 1) // m * m


def _critic_kernel(s_ref, a_ref, w1s_ref, w1a_ref, b1_ref, w2_ref, b2_ref,
                   w3_ref, b3_ref, out_ref):
    w1s = w1s_ref[...]
    w1a = w1a_ref[...]
    w2 = w2_ref[...]
    wdt = w1s.dtype  # matmul operand dtype (f32 or bf16); accumulation is f32

    # Layer 1: split matmul replaces the host-side concat.
    h1 = jnp.tanh(
        jnp.dot(s_ref[...].astype(wdt), w1s, preferred_element_type=jnp.float32)
        + jnp.dot(a_ref[...].astype(wdt), w1a, preferred_element_type=jnp.float32)
        + b1_ref[...].astype(jnp.float32))

    # Layer 2: (TB, 1024) @ (1024, 512) -> tanh.
    h2 = jnp.tanh(
        jnp.dot(h1.astype(wdt), w2, preferred_element_type=jnp.float32)
        + b2_ref[...].astype(jnp.float32))

    # Layer 3: 512 -> 1 projection as VPU multiply + XLU cross-lane reduce
    # (keeps the lane-sparse 1-column matmul off the MXU).
    w3 = w3_ref[...].astype(jnp.float32)                      # (1, 512)
    q = jnp.sum(h2 * w3, axis=-1, keepdims=True) + b3_ref[...].astype(jnp.float32)
    out_ref[...] = q.astype(out_ref.dtype)


def critic_forward(state, action, params, *, block_b=128):
    """Pallas implementation of CriticNetwork.forward.

    state:  (B, state_dim) f32
    action: (B, action_dim) f32
    params: dict with w1_s (state_dim,1024), w1_a (action_dim,1024),
            b1 (1,1024), w2 (1024,512), b2 (1,512), w3 (1,512), b3 (1,1).
            Weights may be f32 or bf16; biases are f32.
    returns: (B, 1) f32
    """
    B, state_dim = state.shape
    action_dim = action.shape[1]

    # Batch tile: multiple of 8 sublanes, capped at block_b; pad B up to a
    # multiple of the tile (padded rows compute garbage and are sliced off).
    tb = min(block_b, _round_up(B, 8))
    padded_b = _round_up(B, tb)
    if padded_b != B:
        pad = padded_b - B
        state = jnp.pad(state, ((0, pad), (0, 0)))
        action = jnp.pad(action, ((0, pad), (0, 0)))

    grid = (padded_b // tb,)

    def rows(i):   # batch-tiled operands
        return (i, 0)

    def const(i):  # weights / biases: constant block -> stay VMEM-resident
        return (0, 0)

    out = pl.pallas_call(
        _critic_kernel,
        out_shape=jax.ShapeDtypeStruct((padded_b, 1), jnp.float32),
        grid=grid,
        in_specs=[
            pl.BlockSpec((tb, state_dim), rows),
            pl.BlockSpec((tb, action_dim), rows),
            pl.BlockSpec((state_dim, HIDDEN1), const),
            pl.BlockSpec((action_dim, HIDDEN1), const),
            pl.BlockSpec((1, HIDDEN1), const),
            pl.BlockSpec((HIDDEN1, HIDDEN2), const),
            pl.BlockSpec((1, HIDDEN2), const),
            pl.BlockSpec((1, HIDDEN2), const),
            pl.BlockSpec((1, 1), const),
        ],
        out_specs=pl.BlockSpec((tb, 1), rows),
        compiler_params=pltpu.CompilerParams(
            dimension_semantics=("parallel",),
            vmem_limit_bytes=16 << 20),
    )(state, action, params["w1_s"], params["w1_a"], params["b1"],
      params["w2"], params["b2"], params["w3"], params["b3"])
    return out[:B]


def init_params(key, state_dim, action_dim, weights_dtype=jnp.float32):
    """Deterministic init mimicking PyTorch nn.Linear default
    (uniform(-1/sqrt(fan_in), 1/sqrt(fan_in))). W1 is stored split by input."""
    d_in = state_dim + action_dim
    ks = jax.random.split(key, 6)

    def unif(k, shape, fan_in):
        bound = 1.0 / jnp.sqrt(jnp.float32(fan_in))
        return jax.random.uniform(k, shape, jnp.float32, -bound, bound)

    w1 = unif(ks[0], (d_in, HIDDEN1), d_in)
    return {
        "w1_s": w1[:state_dim].astype(weights_dtype),
        "w1_a": w1[state_dim:].astype(weights_dtype),
        "b1": unif(ks[1], (1, HIDDEN1), d_in),
        "w2": unif(ks[2], (HIDDEN1, HIDDEN2), HIDDEN1).astype(weights_dtype),
        "b2": unif(ks[3], (1, HIDDEN2), HIDDEN1),
        "w3": unif(ks[4], (1, HIDDEN2), HIDDEN2).astype(weights_dtype),
        "b3": unif(ks[5], (1, 1), HIDDEN2),
    }


def reference_forward(state, action, params):
    """Pure-JAX reference mirroring the kernel's dtype handling."""
    wdt = params["w1_s"].dtype
    h1 = jnp.tanh(
        jnp.dot(state.astype(wdt), params["w1_s"],
                preferred_element_type=jnp.float32)
        + jnp.dot(action.astype(wdt), params["w1_a"],
                  preferred_element_type=jnp.float32)
        + params["b1"])
    h2 = jnp.tanh(
        jnp.dot(h1.astype(wdt), params["w2"],
                preferred_element_type=jnp.float32)
        + params["b2"])
    q = (jnp.sum(h2 * params["w3"].astype(jnp.float32), axis=-1, keepdims=True)
         + params["b3"])
    return q


if __name__ == "__main__":
    key = jax.random.PRNGKey(0)
    k_p, k_s, k_a, k_s2, k_a2 = jax.random.split(key, 5)

    state_dim, action_dim = 16, 8

    # --- small batch (single grid step) ---
    params = init_params(k_p, state_dim, action_dim)
    state = jax.random.normal(k_s, (8, state_dim), jnp.float32)
    action = jax.random.normal(k_a, (8, action_dim), jnp.float32)

    q = jax.block_until_ready(critic_forward(state, action, params))
    q_ref = reference_forward(state, action, params)
    assert q.shape == (8, 1)
    assert jnp.allclose(q, q_ref, atol=1e-5, rtol=1e-5), (
        f"f32 small-batch mismatch: max abs err {jnp.max(jnp.abs(q - q_ref))}")

    # --- larger, non-multiple-of-tile batch (padding + multi-step grid) ---
    state2 = jax.random.normal(k_s2, (200, state_dim), jnp.float32)
    action2 = jax.random.normal(k_a2, (200, action_dim), jnp.float32)

    q2 = jax.block_until_ready(critic_forward(state2, action2, params))
    q2_ref = reference_forward(state2, action2, params)
    assert q2.shape == (200, 1)
    assert jnp.allclose(q2, q2_ref, atol=1e-5, rtol=1e-5), (
        f"f32 batched mismatch: max abs err {jnp.max(jnp.abs(q2 - q2_ref))}")

    # --- bf16 weight streaming (halves HBM weight traffic; f32 accumulation) ---
    params_bf16 = init_params(k_p, state_dim, action_dim,
                              weights_dtype=jnp.bfloat16)
    q3 = jax.block_until_ready(critic_forward(state2, action2, params_bf16))
    q3_ref = reference_forward(state2, action2, params_bf16)
    assert jnp.allclose(q3, q3_ref, atol=1e-2, rtol=1e-2), (
        f"bf16 mismatch: max abs err {jnp.max(jnp.abs(q3 - q3_ref))}")

    print("KERNEL_OK")
</pallas_src>

<mosaic_0001>
module attributes {stable_mosaic.version = 11 : i64} {
  func.func @_critic_kernel(%arg0: i32, %arg1: memref<8x16xf32, #tpu.memory_space<vmem>>, %arg2: memref<8x8xf32, #tpu.memory_space<vmem>>, %arg3: memref<16x1024xf32, #tpu.memory_space<vmem>>, %arg4: memref<8x1024xf32, #tpu.memory_space<vmem>>, %arg5: memref<1x1024xf32, #tpu.memory_space<vmem>>, %arg6: memref<1024x512xf32, #tpu.memory_space<vmem>>, %arg7: memref<1x512xf32, #tpu.memory_space<vmem>>, %arg8: memref<1x512xf32, #tpu.memory_space<vmem>>, %arg9: memref<1x1xf32, #tpu.memory_space<vmem>>, %arg10: memref<8x1xf32, #tpu.memory_space<vmem>>) attributes {dimension_semantics = [#tpu.dimension_semantics<parallel>], iteration_bounds = array<i64: 1>, scalar_prefetch = 0 : i64, scratch_operands = 0 : i64, tpu.core_type = #tpu.core_type<tc>, window_params = [{transform_indices = @transform_0, window_bounds = array<i64: 8, 16>}, {transform_indices = @transform_1, window_bounds = array<i64: 8, 8>}, {pipeline_mode = #tpu.pipeline_mode<synchronous>, transform_indices = @transform_2, window_bounds = array<i64: 16, 1024>}, {pipeline_mode = #tpu.pipeline_mode<synchronous>, transform_indices = @transform_3, window_bounds = array<i64: 8, 1024>}, {pipeline_mode = #tpu.pipeline_mode<synchronous>, transform_indices = @transform_4, window_bounds = array<i64: 1, 1024>}, {pipeline_mode = #tpu.pipeline_mode<synchronous>, transform_indices = @transform_5, window_bounds = array<i64: 1024, 512>}, {pipeline_mode = #tpu.pipeline_mode<synchronous>, transform_indices = @transform_6, window_bounds = array<i64: 1, 512>}, {pipeline_mode = #tpu.pipeline_mode<synchronous>, transform_indices = @transform_7, window_bounds = array<i64: 1, 512>}, {pipeline_mode = #tpu.pipeline_mode<synchronous>, transform_indices = @transform_8, window_bounds = array<i64: 1, 1>}, {transform_indices = @transform_9, window_bounds = array<i64: 8, 1>}]} {
    %c0 = arith.constant 0 : index
    %c0_0 = arith.constant 0 : index
    %0 = vector.load %arg3[%c0, %c0_0] : memref<16x1024xf32, #tpu.memory_space<vmem>>, vector<16x1024xf32>
    %c0_1 = arith.constant 0 : index
    %c0_2 = arith.constant 0 : index
    %1 = vector.load %arg4[%c0_1, %c0_2] : memref<8x1024xf32, #tpu.memory_space<vmem>>, vector<8x1024xf32>
    %c0_3 = arith.constant 0 : index
    %c0_4 = arith.constant 0 : index
    %2 = vector.load %arg6[%c0_3, %c0_4] : memref<1024x512xf32, #tpu.memory_space<vmem>>, vector<1024x512xf32>
    %c0_5 = arith.constant 0 : index
    %c0_6 = arith.constant 0 : index
    %3 = vector.load %arg1[%c0_5, %c0_6] : memref<8x16xf32, #tpu.memory_space<vmem>>, vector<8x16xf32>
    %cst = arith.constant dense<0.000000e+00> : vector<8x1024xf32>
    %4 = tpu.matmul %3, %0, %cst {dimension_numbers = #tpu.dot_dimension_numbers<[1], [0], [0], [1], [0, 0, 1, 1], [], []>} : vector<8x16xf32>, vector<16x1024xf32>, vector<8x1024xf32> -> vector<8x1024xf32>
    %c0_7 = arith.constant 0 : index
    %c0_8 = arith.constant 0 : index
    %5 = vector.load %arg2[%c0_7, %c0_8] : memref<8x8xf32, #tpu.memory_space<vmem>>, vector<8x8xf32>
    %cst_9 = arith.constant dense<0.000000e+00> : vector<8x1024xf32>
    %6 = tpu.matmul %5, %1, %cst_9 {dimension_numbers = #tpu.dot_dimension_numbers<[1], [0], [0], [1], [0, 0, 1, 1], [], []>} : vector<8x8xf32>, vector<8x1024xf32>, vector<8x1024xf32> -> vector<8x1024xf32>
    %7 = arith.addf %4, %6 : vector<8x1024xf32>
    %c0_10 = arith.constant 0 : index
    %c0_11 = arith.constant 0 : index
    %8 = vector.load %arg5[%c0_10, %c0_11] : memref<1x1024xf32, #tpu.memory_space<vmem>>, vector<1x1024xf32>
    %9 = vector.broadcast %8 : vector<1x1024xf32> to vector<8x1024xf32>
    %10 = arith.addf %7, %9 : vector<8x1024xf32>
    %11 = math.tanh %10 : vector<8x1024xf32>
    %cst_12 = arith.constant dense<0.000000e+00> : vector<8x512xf32>
    %12 = tpu.matmul %11, %2, %cst_12 {dimension_numbers = #tpu.dot_dimension_numbers<[1], [0], [0], [1], [0, 0, 1, 1], [], []>} : vector<8x1024xf32>, vector<1024x512xf32>, vector<8x512xf32> -> vector<8x512xf32>
    %c0_13 = arith.constant 0 : index
    %c0_14 = arith.constant 0 : index
    %13 = vector.load %arg7[%c0_13, %c0_14] : memref<1x512xf32, #tpu.memory_space<vmem>>, vector<1x512xf32>
    %14 = vector.broadcast %13 : vector<1x512xf32> to vector<8x512xf32>
    %15 = arith.addf %12, %14 : vector<8x512xf32>
    %16 = math.tanh %15 : vector<8x512xf32>
    %c0_15 = arith.constant 0 : index
    %c0_16 = arith.constant 0 : index
    %17 = vector.load %arg8[%c0_15, %c0_16] : memref<1x512xf32, #tpu.memory_space<vmem>>, vector<1x512xf32>
    %18 = vector.broadcast %17 : vector<1x512xf32> to vector<8x512xf32>
    %19 = arith.mulf %16, %18 : vector<8x512xf32>
    %cst_17 = arith.constant dense<0.000000e+00> : vector<8xf32>
    %20 = vector.multi_reduction <add>, %19, %cst_17 [1] : vector<8x512xf32> to vector<8xf32>
    %21 = vector.shape_cast %20 : vector<8xf32> to vector<8x1xf32>
    %c0_18 = arith.constant 0 : index
    %c0_19 = arith.constant 0 : index
    %22 = vector.load %arg9[%c0_18, %c0_19] : memref<1x1xf32, #tpu.memory_space<vmem>>, vector<1x1xf32>
    %23 = vector.broadcast %22 : vector<1x1xf32> to vector<8x1xf32>
    %24 = arith.addf %21, %23 : vector<8x1xf32>
    %c0_20 = arith.constant 0 : index
    %c0_21 = arith.constant 0 : index
    %25 = vector.load %arg10[%c0_20, %c0_21] : memref<8x1xf32, #tpu.memory_space<vmem>>, vector<8x1xf32>
    tpu.vector_store %arg10[%c0_20, %c0_21], %24 {strides = array<i32>} : memref<8x1xf32, #tpu.memory_space<vmem>>, vector<8x1xf32>,
    return
  }
  func.func @transform_0(%arg0: i32) -> (i32, i32) {
    %c0_i32 = arith.constant 0 : i32
    %c0_i32_0 = arith.constant 0 : i32
    return %arg0, %c0_i32 : i32, i32
  }
  func.func @transform_1(%arg0: i32) -> (i32, i32) {
    %c0_i32 = arith.constant 0 : i32
    %c0_i32_0 = arith.constant 0 : i32
    return %arg0, %c0_i32 : i32, i32
  }
  func.func @transform_2(%arg0: i32) -> (i32, i32) {
    %c0_i32 = arith.constant 0 : i32
    %c0_i32_0 = arith.constant 0 : i32
    %c0_i32_1 = arith.constant 0 : i32
    return %c0_i32, %c0_i32_0 : i32, i32
  }
  func.func @transform_3(%arg0: i32) -> (i32, i32) {
    %c0_i32 = arith.constant 0 : i32
    %c0_i32_0 = arith.constant 0 : i32
    %c0_i32_1 = arith.constant 0 : i32
    return %c0_i32, %c0_i32_0 : i32, i32
  }
  func.func @transform_4(%arg0: i32) -> (i32, i32) {
    %c0_i32 = arith.constant 0 : i32
    %c0_i32_0 = arith.constant 0 : i32
    %c0_i32_1 = arith.constant 0 : i32
    return %c0_i32, %c0_i32_0 : i32, i32
  }
  func.func @transform_5(%arg0: i32) -> (i32, i32) {
    %c0_i32 = arith.constant 0 : i32
    %c0_i32_0 = arith.constant 0 : i32
    %c0_i32_1 = arith.constant 0 : i32
    return %c0_i32, %c0_i32_0 : i32, i32
  }
  func.func @transform_6(%arg0: i32) -> (i32, i32) {
    %c0_i32 = arith.constant 0 : i32
    %c0_i32_0 = arith.constant 0 : i32
    %c0_i32_1 = arith.constant 0 : i32
    return %c0_i32, %c0_i32_0 : i32, i32
  }
  func.func @transform_7(%arg0: i32) -> (i32, i32) {
    %c0_i32 = arith.constant 0 : i32
    %c0_i32_0 = arith.constant 0 : i32
    %c0_i32_1 = arith.constant 0 : i32
    return %c0_i32, %c0_i32_0 : i32, i32
  }
  func.func @transform_8(%arg0: i32) -> (i32, i32) {
    %c0_i32 = arith.constant 0 : i32
    %c0_i32_0 = arith.constant 0 : i32
    %c0_i32_1 = arith.constant 0 : i32
    return %c0_i32, %c0_i32_0 : i32, i32
  }
  func.func @transform_9(%arg0: i32) -> (i32, i32) {
    %c0_i32 = arith.constant 0 : i32
    %c0_i32_0 = arith.constant 0 : i32
    return %arg0, %c0_i32 : i32, i32
  }
}

</mosaic_0001>

<bundles_post_ra>
// kernel: tpu_custom_call.1
= control target key start
LH: loop header
LB: loop body
LE: loop exit
PB: predicated region body
PF: predicated region fallthrough
CT: control target
= control target key end

     0   :  { %s2979_s0 = inlined_call_operand.hbm [shape: f32[8,16], index: 0, kind: input, shape index: {}]   ;;  %s2980_s1 = inlined_call_operand.hbm [shape: f32[8,8], index: 1, kind: input, shape index: {}]   ;;  %s2981_s2 = inlined_call_operand.hbm [shape: f32[16,1024], index: 2, kind: input, shape index: {}]   ;;  %s2982_s3 = inlined_call_operand.hbm [shape: f32[8,1024], index: 3, kind: input, shape index: {}]   ;;  %s2983_s4 = inlined_call_operand.hbm [shape: f32[1,1024], index: 4, kind: input, shape index: {}]   ;;  %s2984_s5 = inlined_call_operand.hbm [shape: f32[1024,512], index: 5, kind: input, shape index: {}]   ;;  %s2985_s6 = inlined_call_operand.hbm [shape: f32[1,512], index: 6, kind: input, shape index: {}]   ;;  %s2986_s7 = inlined_call_operand.hbm [shape: f32[1,512], index: 7, kind: input, shape index: {}]   ;;  %s2987_s8 = inlined_call_operand.<no memory space> [shape: f32[1,1], index: 8, kind: input, shape index: {}]   ;;  %s2988_s9 = inlined_call_operand.vmem [shape: f32[8,1], index: 9, kind: output, shape index: {}]  }
   0x1   :  { %v14_v0 = vstv %s2987_s8 }
   0x2   :  { %15 = vst [vmem:[#allocation2] sm:$0x1] %v14_v0 }
   0x3   :  { %16 = vsyncpa [#allocation4], 0 }
   0x4   :  { %17 = vsyncpa [#allocation6], 0 }
   0x5   :  { %18 = vsyncpa [#allocation9], 0 }
   0x6   :  { %19 = vsyncpa [#allocation12], 0 }
   0x7   :  { %20 = vsyncpa [#allocation15], 0  ;;  %s2731_s11 = smov [#allocation5]   ;;  %s2732_s13 = smov [#allocation8]  }
   0x8   :  { %s37_s12 = sshll.u32 %s2731_s11, 4  ;;  %s59_s14 = sshll.u32 %s2732_s13, 4  ;;  %s38_s12 = int_to_ptr.vmem [resolvable:$true] %s37_s12  ;;  %s60_s14 = int_to_ptr.vmem [resolvable:$true] %s59_s14 }
   0x9   :  { %s2545_s17 = scalar_lea.hbm %s2980_s1, 128 }
   0xa   :  { %p2546_p0 = scmp.ne.s32.totalorder %s2980_s1, %s2545_s17  ;;  %p2549_p1 = scmp.lt.u32.totalorder %s2545_s17, %s2980_s1 }
   0xc   :  { %p2551_p2 = pnand %p2549_p1, %p2546_p0 }
   0xe   :  { %2554 = shalt.err (!%p2551_p2)
}
   0xf   :  { %s2555_s21 = scalar_lea.vmem %s38_s12, 128  ;;  %p2560_p4 = scmp.lt.s32.totalorder %s38_s12, %s38_s12 }
  0x10   :  { %p2556_p3 = scmp.ne.s32.totalorder %s38_s12, %s2555_s21  ;;  %p2561_p5 = scmp.lt.s32.totalorder %s2555_s21, %s2555_s21 }
  0x12   :  { %p2562_p6 = por %p2561_p5, %p2560_p4 }
  0x14   :  { %p2563_p7 = pnand %p2562_p6, %p2556_p3 }
  0x16   :  { %2566 = shalt.err (!%p2563_p7)
}
  0x17   :  { %40 = dma.hbm_to_vmem [thread:$0]  %s2980_s1, 128, %s38_s12, [#allocation6]  }
  0x18   :  { %s2567_s26 = scalar_lea.hbm %s2982_s3, 1024 }
  0x19   :  { %p2568_p8 = scmp.ne.s32.totalorder %s2982_s3, %s2567_s26  ;;  %p2571_p9 = scmp.lt.u32.totalorder %s2567_s26, %s2982_s3 }
  0x1b   :  { %p2573_p10 = pnand %p2571_p9, %p2568_p8 }
  0x1d   :  { %2576 = shalt.err (!%p2573_p10)
}
  0x1e   :  { %s2577_s10 = scalar_lea.vmem %s60_s14, 1024  ;;  %p2582_p12 = scmp.lt.s32.totalorder %s60_s14, %s60_s14 }
  0x1f   :  { %p2578_p11 = scmp.ne.s32.totalorder %s60_s14, %s2577_s10  ;;  %p2583_p13 = scmp.lt.s32.totalorder %s2577_s10, %s2577_s10 }
  0x21   :  { %p2584_p0 = por %p2583_p13, %p2582_p12 }
  0x23   :  { %p2585_p1 = pnand %p2584_p0, %p2578_p11 }
  0x25   :  { %2588 = shalt.err (!%p2585_p1)
}
  0x26   :  { %62 = dma.hbm_to_vmem [thread:$0]  %s2982_s3, 1024, %s60_s14, [#allocation9]  }
  0x27   :  { %s2733_s12 = smov [#allocation11]   ;;  %s2589_s17 = scalar_lea.hbm %s2984_s5, 65536 }
  0x28   :  { %s78_s13 = sshll.u32 %s2733_s12, 4  ;;  %p2590_p2 = scmp.ne.s32.totalorder %s2984_s5, %s2589_s17  ;;  %s79_s13 = int_to_ptr.vmem [resolvable:$true] %s78_s13 }
  0x29   :  { %p2593_p3 = scmp.lt.u32.totalorder %s2589_s17, %s2984_s5 }
  0x2b   :  { %p2595_p4 = pnand %p2593_p3, %p2590_p2 }
  0x2d   :  { %2598 = shalt.err (!%p2595_p4)
}
  0x2e   :  { %s2599_s21 = scalar_lea.vmem %s79_s13, 65536  ;;  %p2604_p6 = scmp.lt.s32.totalorder %s79_s13, %s79_s13 }
  0x2f   :  { %p2600_p5 = scmp.ne.s32.totalorder %s79_s13, %s2599_s21  ;;  %p2605_p7 = scmp.lt.s32.totalorder %s2599_s21, %s2599_s21 }
  0x31   :  { %p2606_p8 = por %p2605_p7, %p2604_p6 }
  0x33   :  { %p2607_p9 = pnand %p2606_p8, %p2600_p5 }
  0x35   :  { %2610 = shalt.err (!%p2607_p9)
}
  0x36   :  { %s2734_s3 = smov 512   ;;  %s2735_s14 = smov 32  }
  0x37   :  { %84 = dma.hbm_to_vmem [thread:$0]  %s2984_s5, 65536, %s79_s13, [#allocation12], %s2734_s3, %s2734_s3, %s2735_s14  }
  0x38   :  { %s2736_s24 = smov [#allocation3]   ;;  %s2737_s26 = smov [#allocation7]  }
  0x39   :  { %s27_s25 = sshll.u32 %s2736_s24, 4  ;;  %s46_s27 = sshll.u32 %s2737_s26, 4  ;;  %s28_s25 = int_to_ptr.vmem [resolvable:$true] %s27_s25  ;;  %s47_s27 = int_to_ptr.vmem [resolvable:$true] %s46_s27 }
  0x3a   :  { %s2611_s30 = scalar_lea.hbm %s2979_s0, 128 }
  0x3b   :  { %p2612_p10 = scmp.ne.s32.totalorder %s2979_s0, %s2611_s30  ;;  %p2615_p11 = scmp.lt.u32.totalorder %s2611_s30, %s2979_s0 }
  0x3d   :  { %p2617_p12 = pnand %p2615_p11, %p2612_p10 }
  0x3f   :  { %2620 = shalt.err (!%p2617_p12)
}
  0x40   :  { %s2621_s5 = scalar_lea.vmem %s28_s25, 128  ;;  %p2626_p0 = scmp.lt.s32.totalorder %s28_s25, %s28_s25 }
  0x41   :  { %p2622_p13 = scmp.ne.s32.totalorder %s28_s25, %s2621_s5  ;;  %p2627_p1 = scmp.lt.s32.totalorder %s2621_s5, %s2621_s5 }
  0x43   :  { %p2628_p2 = por %p2627_p1, %p2626_p0 }
  0x45   :  { %p2629_p3 = pnand %p2628_p2, %p2622_p13 }
  0x47   :  { %2632 = shalt.err (!%p2629_p3)
}
  0x48   :  { %30 = dma.hbm_to_vmem [thread:$0]  %s2979_s0, 128, %s28_s25, [#allocation4]  }
  0x49   :  { %s2633_s18 = scalar_lea.hbm %s2981_s2, 2048 }
  0x4a   :  { %p2634_p4 = scmp.ne.s32.totalorder %s2981_s2, %s2633_s18  ;;  %p2637_p5 = scmp.lt.u32.totalorder %s2633_s18, %s2981_s2 }
  0x4c   :  { %p2639_p6 = pnand %p2637_p5, %p2634_p4 }
  0x4e   :  { %2642 = shalt.err (!%p2639_p6)
}
  0x4f   :  { %s2643_s3 = scalar_lea.vmem %s47_s27, 2048  ;;  %p2648_p8 = scmp.lt.s32.totalorder %s47_s27, %s47_s27 }
  0x50   :  { %p2644_p7 = scmp.ne.s32.totalorder %s47_s27, %s2643_s3  ;;  %p2649_p9 = scmp.lt.s32.totalorder %s2643_s3, %s2643_s3 }
  0x52   :  { %p2650_p10 = por %p2649_p9, %p2648_p8 }
  0x54   :  { %p2651_p11 = pnand %p2650_p10, %p2644_p7 }
  0x56   :  { %2654 = shalt.err (!%p2651_p11)
}
  0x57   :  { %s2738_s0 = smov 1024   ;;  %s2739_s14 = smov 64  }
  0x58   :  { %52 = dma.hbm_to_vmem [thread:$0]  %s2981_s2, 2048, %s47_s27, [#allocation6], %s2738_s0, %s2738_s0, %s2739_s14  }
  0x59   :  { %s2740_s24 = smov [#allocation10]   ;;  %s2741_s26 = smov [#allocation13]  }
  0x5a   :  { %s69_s25 = sshll.u32 %s2740_s24, 4  ;;  %s91_s28 = sshll.u32 %s2741_s26, 4  ;;  %s70_s25 = int_to_ptr.vmem [resolvable:$true] %s69_s25  ;;  %s92_s28 = int_to_ptr.vmem [resolvable:$true] %s91_s28 }
  0x5b   :  { %s2655_s10 = scalar_lea.hbm %s2983_s4, 128 }
  0x5c   :  { %p2656_p12 = scmp.ne.s32.totalorder %s2983_s4, %s2655_s10  ;;  %p2659_p13 = scmp.lt.u32.totalorder %s2655_s10, %s2983_s4 }
  0x5e   :  { %p2661_p0 = pnand %p2659_p13, %p2656_p12 }
  0x60   :  { %2664 = shalt.err (!%p2661_p0)
}
  0x61   :  { %s2665_s2 = scalar_lea.vmem %s70_s25, 128  ;;  %p2670_p2 = scmp.lt.s32.totalorder %s70_s25, %s70_s25 }
  0x62   :  { %p2666_p1 = scmp.ne.s32.totalorder %s70_s25, %s2665_s2  ;;  %p2671_p3 = scmp.lt.s32.totalorder %s2665_s2, %s2665_s2 }
  0x64   :  { %p2672_p4 = por %p2671_p3, %p2670_p2 }
  0x66   :  { %p2673_p5 = pnand %p2672_p4, %p2666_p1 }
  0x68   :  { %2676 = shalt.err (!%p2673_p5)
}
  0x69   :  { %72 = dma.hbm_to_vmem [thread:$0]  %s2983_s4, 128, %s70_s25, [#allocation9]  }
  0x6a   :  { %s2677_s17 = scalar_lea.hbm %s2985_s6, 64 }
  0x6b   :  { %p2678_p6 = scmp.ne.s32.totalorder %s2985_s6, %s2677_s17  ;;  %p2681_p7 = scmp.lt.u32.totalorder %s2677_s17, %s2985_s6 }
  0x6d   :  { %p2683_p8 = pnand %p2681_p7, %p2678_p6 }
  0x6f   :  { %2686 = shalt.err (!%p2683_p8)
}
  0x70   :  { %s2687_s21 = scalar_lea.vmem %s92_s28, 64  ;;  %p2692_p10 = scmp.lt.s32.totalorder %s92_s28, %s92_s28 }
  0x71   :  { %p2688_p9 = scmp.ne.s32.totalorder %s92_s28, %s2687_s21  ;;  %p2693_p11 = scmp.lt.s32.totalorder %s2687_s21, %s2687_s21 }
  0x73   :  { %p2694_p12 = por %p2693_p11, %p2692_p10 }
  0x75   :  { %p2695_p13 = pnand %p2694_p12, %p2688_p9 }
  0x77   :  { %2698 = shalt.err (!%p2695_p13)
}
  0x78   :  { %94 = dma.hbm_to_vmem [thread:$0]  %s2985_s6, 64, %s92_s28, [#allocation12]  }
  0x79   :  { %s2742_s0 = smov [#allocation14]   ;;  %s2699_s24 = scalar_lea.hbm %s2986_s7, 64 }
  0x7a   :  { %s101_s14 = sshll.u32 %s2742_s0, 4  ;;  %p2700_p0 = scmp.ne.s32.totalorder %s2986_s7, %s2699_s24  ;;  %s102_s14 = int_to_ptr.vmem [resolvable:$true] %s101_s14 }
  0x7b   :  { %p2703_p1 = scmp.lt.u32.totalorder %s2699_s24, %s2986_s7 }
  0x7d   :  { %p2705_p2 = pnand %p2703_p1, %p2700_p0 }
  0x7f   :  { %2708 = shalt.err (!%p2705_p2)
}
  0x80   :  { %s2709_s10 = scalar_lea.vmem %s102_s14, 64  ;;  %p2714_p4 = scmp.lt.s32.totalorder %s102_s14, %s102_s14 }
  0x81   :  { %p2710_p3 = scmp.ne.s32.totalorder %s102_s14, %s2709_s10  ;;  %p2715_p5 = scmp.lt.s32.totalorder %s2709_s10, %s2709_s10 }
  0x83   :  { %p2716_p6 = por %p2715_p5, %p2714_p4 }
  0x85   :  { %p2717_p7 = pnand %p2716_p6, %p2710_p3 }
  0x87   :  { %2720 = shalt.err (!%p2717_p7)
}
  0x88   :  { %104 = dma.hbm_to_vmem [thread:$0]  %s2986_s7, 64, %s102_s14, [#allocation15]  }
  0x89   :  { %2721 = dma.done.wait [#allocation4], 128  }
  0x8a   :  { %2722 = vsyncadd [#allocation4], 4294967168 }
  0x8b   :  { %2723 = dma.done.wait [#allocation6], 2176  }
  0x8c   :  { %2724 = vsyncadd [#allocation6], 4294965120 }
  0x8d   :  { %2725 = dma.done.wait [#allocation9], 1152  }
  0x8e   :  { %2726 = vsyncadd [#allocation9], 4294966144 }
  0x8f   :  { %2727 = dma.done.wait [#allocation12], 65600  }
  0x90   :  { %2728 = vsyncadd [#allocation12], 4294901696 }
  0x91   :  { %2729 = dma.done.wait [#allocation15], 64  }
  0x92   :  { %2730 = vsyncadd [#allocation15], 4294967232  ;;  %v2743_v1 = vmov 0.0   ;;  %v148_v2 = vld [vmem:[#allocation8 + $0x8] sm:$0xff]  ;;  %v147_v3 = vld [vmem:[#allocation8] sm:$0xff]  ;;  %vm669_vm0 = vcmask 64512  }
  0x93   :  { %737 = vmatprep.mubr.f32.mxu0 %v2743_v1  ;;  %808 = vmatprep.mubr.f32.mxu1 %v2743_v1  ;;  %v668_v4 = vld [vmem:[#allocation5] sm:$0xff]  ;;  %v152_v5 = vld [vmem:[#allocation8 + $0x28] sm:$0xff]  ;;  %v151_v6 = vld [vmem:[#allocation8 + $0x20] sm:$0xff]  ;;  %vm957_vm1 = vcmask 130048   ;;  %vm1936_vm2 = vcmask 7168  }
  0x94   :  { %673 = vmatprep.subr.mxu0 %v148_v2  ;;  %v132_v7 = vld [vmem:[#allocation7 + $0x8] sm:$0xff]  ;;  %v131_v9 = vld [vmem:[#allocation7] sm:$0xff]  ;;  %v150_v15 = vld [vmem:[#allocation8 + $0x18] sm:$0xff] }
  0x95   :  { %674 = vmatpush1.msra.mxu0 %v147_v3  ;;  %v140_v8 = vld [vmem:[#allocation7 + $0x48] sm:$0xff]  ;;  %v139_v10 = vld [vmem:[#allocation7 + $0x40] sm:$0xff]  ;;  %744 = vmatprep.subr.mxu1 %v150_v15  ;;  %v149_v19 = vld [vmem:[#allocation8 + $0x10] sm:$0xff] }
  0x96   :  { %1947 = vmatmul.mubr.msk.f32.vlgmr.msra.gmra.mrb[0].mxu0 %vm669_vm0, %v668_v4  ;;  %815 = vmatprep.subr.mxu0 %v152_v5  ;;  %v1956_v11 = vpack.c.bf16 %v140_v8, %v132_v7  ;;  %v136_v12 = vld [vmem:[#allocation7 + $0x28] sm:$0xff]  ;;  %v1958_v14 = vpack.c.bf16 %v139_v10, %v131_v9  ;;  %v135_v17 = vld [vmem:[#allocation7 + $0x20] sm:$0xff]  ;;  %v2897_v20 = vld [vmem:[#allocation3] sm:$0xff] }
  0x97   :  { %v144_v13 = vld [vmem:[#allocation7 + $0x68] sm:$0xff]  ;;  %816 = vmatpush1.msra.mxu0 %v151_v6  ;;  %879 = vmatprep.mubr.f32.mxu0 %v2743_v1  ;;  %v143_v18 = vld [vmem:[#allocation7 + $0x60] sm:$0xff]  ;;  %v154_v21 = vld [vmem:[#allocation8 + $0x38] sm:$0xff] }
  0x98   :  { %1957 = vmatprep.subr.bf16.mxu0 %v1956_v11  ;;  %v1964_v16 = vpack.c.bf16 %v144_v13, %v136_v12  ;;  %745 = vmatpush1.msra.mxu1 %v149_v19  ;;  %v134_v22 = vld [vmem:[#allocation7 + $0x18] sm:$0xff]  ;;  %v153_v24 = vld [vmem:[#allocation8 + $0x30] sm:$0xff]  ;;  %v1966_v27 = vpack.c.bf16 %v143_v18, %v135_v17  ;;  %v155_v36 = vld [vmem:[#allocation11] sm:$0xff] }
  0x99   :  { %v142_v23 = vld [vmem:[#allocation7 + $0x58] sm:$0xff]  ;;  %1948 = vmatmul.mubr.msk.f32.vlgmr.msra.gmra.mrb[0].mxu1 %vm669_vm0, %v668_v4  ;;  %v133_v25 = vld [vmem:[#allocation7 + $0x10] sm:$0xff]  ;;  %886 = vmatprep.subr.mxu1 %v154_v21  ;;  %v159_v37 = vld [vmem:[#allocation11 + $0x20] sm:$0xff] }
  0x9a   :  { %1949 = vmatmul.mubr.msk.f32.vlgmr.msra.gmra.mrb[2].mxu0 %vm669_vm0, %v668_v4  ;;  %v141_v26 = vld [vmem:[#allocation7 + $0x50] sm:$0xff]  ;;  %v138_v28 = vld [vmem:[#allocation7 + $0x38] sm:$0xff]  ;;  %v1960_v31 = vpack.c.bf16 %v142_v23, %v134_v22  ;;  %887 = vmatpush1.msra.mxu1 %v153_v24  ;;  %v158_v42 = vld [vmem:[#allocation11 + $0x18] sm:$0xff]  ;;  %v1974_v44 = vpack.c.bf16 %v159_v37, %v155_v36 }
  0x9b   :  { %1959 = vmatpush1.bf16.msra.mxu0 %v1958_v14  ;;  %1025 = vmatprep.mubr.f32.mxu0 %v2743_v1  ;;  %v146_v29 = vld [vmem:[#allocation7 + $0x78] sm:$0xff]  ;;  %v156_v30 = vld [vmem:[#allocation11 + $0x8] sm:$0xff]  ;;  %v1962_v33 = vpack.c.bf16 %v141_v26, %v133_v25  ;;  %v162_v43 = vld [vmem:[#allocation11 + $0x38] sm:$0xff] }
  0x9c   :  { %1965 = vmatprep.subr.bf16.mxu0 %v1964_v16  ;;  %v160_v32 = vld [vmem:[#allocation11 + $0x28] sm:$0xff]  ;;  %950 = vmatprep.mubr.f32.mxu1 %v2743_v1  ;;  %v1968_v38 = vpack.c.bf16 %v146_v29, %v138_v28  ;;  %v163_v46 = vld [vmem:[#allocation11 + $0x40] sm:$0xff]  ;;  %v2228_v51 = vpack.c.bf16 %v162_v43, %v158_v42  ;;  %v157_v52 = vld [vmem:[#allocation11 + $0x10] sm:$0xff] }
  0x9d   :  { %v137_v34 = vld [vmem:[#allocation7 + $0x30] sm:$0xff]  ;;  %v1972_v35 = vpack.c.bf16 %v160_v32, %v156_v30  ;;  %1950 = vmatmul.mubr.msk.f32.vlgmr.msra.gmra.mrb[2].mxu1 %vm669_vm0, %v668_v4  ;;  %1961 = vmatprep.subr.bf16.mxu1 %v1960_v31  ;;  %v167_v47 = vld [vmem:[#allocation11 + $0x60] sm:$0xff]  ;;  %v161_v53 = vld [vmem:[#allocation11 + $0x30] sm:$0xff] }
  0x9e   :  { %1951 = vmatmul.mubr.msk.f32.vlgmr.msra.gmra.mrb[0].mxu0 %vm957_vm1, %v2897_v20  ;;  %v145_v39 = vld [vmem:[#allocation7 + $0x70] sm:$0xff]  ;;  %1096 = vmatprep.mubr.f32.mxu1 %v2743_v1  ;;  %v166_v54 = vld [vmem:[#allocation11 + $0x58] sm:$0xff]  ;;  %v1978_v56 = vpack.c.bf16 %v167_v47, %v163_v46  ;;  %v171_v58 = vld [vmem:[#allocation11 + $0x80] sm:$0xff]  ;;  %v2230_v60 = vpack.c.bf16 %v161_v53, %v157_v52 }
  0x9f   :  { %v164_v40 = vld [vmem:[#allocation11 + $0x48] sm:$0xff]  ;;  %1967 = vmatpush1.bf16.msra.mxu0 %v1966_v27  ;;  %1167 = vmatprep.mubr.f32.mxu0 %v2743_v1  ;;  %v1970_v48 = vpack.c.bf16 %v145_v39, %v137_v34  ;;  %v170_v55 = vld [vmem:[#allocation11 + $0x78] sm:$0xff]  ;;  %v175_v59 = vld [vmem:[#allocation11 + $0xa0] sm:$0xff] }
  0xa0   :  { %v168_v41 = vld [vmem:[#allocation11 + $0x68] sm:$0xff]  ;;  %1963 = vmatpush1.bf16.msra.mxu1 %v1962_v33  ;;  %1973 = vmatprep.subr.bf16.mxu0 %v1972_v35  ;;  %v2232_v63 = vpack.c.bf16 %v170_v55, %v166_v54  ;;  %v165_v0 = vld [vmem:[#allocation11 + $0x50] sm:$0xff]  ;;  %v174_v3 = vld [vmem:[#allocation11 + $0x98] sm:$0xff]  ;;  %v1982_v5 = vpack.c.bf16 %v175_v59, %v171_v58 }
  0xa1   :  { %v1976_v45 = vpack.c.bf16 %v168_v41, %v164_v40  ;;  %v172_v49 = vld [vmem:[#allocation11 + $0x88] sm:$0xff]  ;;  %1969 = vmatprep.subr.bf16.mxu1 %v1968_v38  ;;  %v169_v2 = vld [vmem:[#allocation11 + $0x70] sm:$0xff]  ;;  %v178_v4 = vld [vmem:[#allocation11 + $0xb8] sm:$0xff] }
  0xa2   :  { %v176_v50 = vld [vmem:[#allocation11 + $0xa8] sm:$0xff]  ;;  %1953 = vmatmul.mubr.msk.f32.vlgmr.msra.gmra.mrb[2].mxu0 %vm957_vm1, %v2897_v20  ;;  %v179_v7 = vld [vmem:[#allocation11 + $0xc0] sm:$0xff]  ;;  %v2236_v11 = vpack.c.bf16 %v178_v4, %v174_v3  ;;  %v173_v12 = vld [vmem:[#allocation11 + $0x90] sm:$0xff] }
  0xa3   :  { %1975 = vmatpush1.bf16.msra.mxu0 %v1974_v44  ;;  %1952 = vmatmul.mubr.msk.f32.vlgmr.msra.gmra.mrb[0].mxu1 %vm957_vm1, %v2897_v20  ;;  %v1980_v57 = vpack.c.bf16 %v176_v50, %v172_v49  ;;  %v180_v61 = vld [vmem:[#allocation11 + $0xc8] sm:$0xff]  ;;  %v183_v8 = vld [vmem:[#allocation11 + $0xe0] sm:$0xff]  ;;  %v177_v13 = vld [vmem:[#allocation11 + $0xb0] sm:$0xff] }
  0xa4   :  { %1977 = vmatprep.subr.bf16.mxu0 %v1976_v45  ;;  %1971 = vmatpush1.bf16.msra.mxu1 %v1970_v48  ;;  %v184_v62 = vld [vmem:[#allocation11 + $0xe8] sm:$0xff]  ;;  %v182_v14 = vld [vmem:[#allocation11 + $0xd8] sm:$0xff]  ;;  %v1986_v16 = vpack.c.bf16 %v183_v8, %v179_v7  ;;  %v187_v18 = vld [vmem:[#allocation11 + $0x100] sm:$0xff] }
  0xa5   :  { %1238 = vmatprep.mubr.f32.mxu1 %v2743_v1  ;;  %2229 = vmatprep.subr.bf16.mxu1 %v2228_v51  ;;  %v1984_v6 = vpack.c.bf16 %v184_v62, %v180_v61  ;;  %v2234_v1 = vpack.c.bf16 %v169_v2, %v165_v0  ;;  %v188_v9 = vld [vmem:[#allocation11 + $0x108] sm:$0xff]  ;;  %v186_v15 = vld [vmem:[#allocation11 + $0xf8] sm:$0xff]  ;;  %v191_v19 = vld [vmem:[#allocation11 + $0x120] sm:$0xff] }
  0xa6   :  { %v192_v10 = vld [vmem:[#allocation11 + $0x128] sm:$0xff]  ;;  %v2240_v23 = vpack.c.bf16 %v186_v15, %v182_v14  ;;  %v181_v24 = vld [vmem:[#allocation11 + $0xd0] sm:$0xff]  ;;  %v190_v26 = vld [vmem:[#allocation11 + $0x118] sm:$0xff]  ;;  %v1990_v28 = vpack.c.bf16 %v191_v19, %v187_v18 }
  0xa7   :  { %1979 = vmatpush1.bf16.msra.mxu0 %v1978_v56  ;;  %1954 = vmatmul.mubr.msk.f32.vlgmr.msra.gmra.mrb[2].mxu1 %vm957_vm1, %v2897_v20  ;;  %v1988_v17 = vpack.c.bf16 %v192_v10, %v188_v9  ;;  %v2238_v20 = vpack.c.bf16 %v177_v13, %v173_v12  ;;  %v196_v21 = vld [vmem:[#allocation11 + $0x148] sm:$0xff]  ;;  %v185_v25 = vld [vmem:[#allocation11 + $0xf0] sm:$0xff]  ;;  %v194_v27 = vld [vmem:[#allocation11 + $0x138] sm:$0xff] }
  0xa8   :  { %1981 = vmatprep.subr.bf16.mxu0 %v1980_v57  ;;  %2231 = vmatpush1.bf16.msra.mxu1 %v2230_v60  ;;  %v200_v22 = vld [vmem:[#allocation11 + $0x168] sm:$0xff]  ;;  %v195_v30 = vld [vmem:[#allocation11 + $0x140] sm:$0xff]  ;;  %v2242_v32 = vpack.c.bf16 %v185_v25, %v181_v24  ;;  %v2244_v35 = vpack.c.bf16 %v194_v27, %v190_v26  ;;  %v189_v36 = vld [vmem:[#allocation11 + $0x110] sm:$0xff] }
  0xa9   :  { %2233 = vmatprep.subr.bf16.mxu1 %v2232_v63  ;;  %v1992_v29 = vpack.c.bf16 %v200_v22, %v196_v21  ;;  %v199_v31 = vld [vmem:[#allocation11 + $0x160] sm:$0xff]  ;;  %v204_v33 = vld [vmem:[#allocation11 + $0x188] sm:$0xff]  ;;  %v193_v37 = vld [vmem:[#allocation11 + $0x130] sm:$0xff] }
  0xaa   :  { %v208_v34 = vld [vmem:[#allocation11 + $0x1a8] sm:$0xff]  ;;  %v198_v38 = vld [vmem:[#allocation11 + $0x158] sm:$0xff]  ;;  %v1994_v40 = vpack.c.bf16 %v199_v31, %v195_v30  ;;  %v203_v42 = vld [vmem:[#allocation11 + $0x180] sm:$0xff]  ;;  %v2246_v44 = vpack.c.bf16 %v193_v37, %v189_v36 }
  0xab   :  { %1983 = vmatpush1.bf16.msra.mxu0 %v1982_v5  ;;  %v202_v39 = vld [vmem:[#allocation11 + $0x178] sm:$0xff]  ;;  %v1996_v41 = vpack.c.bf16 %v208_v34, %v204_v33  ;;  %v207_v43 = vld [vmem:[#allocation11 + $0x1a0] sm:$0xff]  ;;  %v212_v45 = vld [vmem:[#allocation11 + $0x1c8] sm:$0xff] }
  0xac   :  { %1985 = vmatprep.subr.bf16.mxu0 %v1984_v6  ;;  %2235 = vmatpush1.bf16.msra.mxu1 %v2234_v1  ;;  %v216_v46 = vld [vmem:[#allocation11 + $0x1e8] sm:$0xff]  ;;  %v2248_v47 = vpack.c.bf16 %v202_v39, %v198_v38  ;;  %v197_v48 = vld [vmem:[#allocation11 + $0x150] sm:$0xff]  ;;  %v206_v50 = vld [vmem:[#allocation11 + $0x198] sm:$0xff]  ;;  %v1998_v52 = vpack.c.bf16 %v207_v43, %v203_v42 }
  0xad   :  { %2237 = vmatprep.subr.bf16.mxu1 %v2236_v11  ;;  %v201_v49 = vld [vmem:[#allocation11 + $0x170] sm:$0xff]  ;;  %v210_v51 = vld [vmem:[#allocation11 + $0x1b8] sm:$0xff]  ;;  %v2000_v53 = vpack.c.bf16 %v216_v46, %v212_v45  ;;  %v211_v54 = vld [vmem:[#allocation11 + $0x1c0] sm:$0xff] }
  0xae   :  { %v215_v55 = vld [vmem:[#allocation11 + $0x1e0] sm:$0xff]  ;;  %v2250_v56 = vpack.c.bf16 %v201_v49, %v197_v48  ;;  %v220_v57 = vld [vmem:[#allocation11 + $0x208] sm:$0xff]  ;;  %v2252_v59 = vpack.c.bf16 %v210_v51, %v206_v50  ;;  %v205_v60 = vld [vmem:[#allocation11 + $0x190] sm:$0xff] }
  0xaf   :  { %1987 = vmatpush1.bf16.msra.mxu0 %v1986_v16  ;;  %v224_v58 = vld [vmem:[#allocation11 + $0x228] sm:$0xff]  ;;  %v209_v61 = vld [vmem:[#allocation11 + $0x1b0] sm:$0xff]  ;;  %v214_v62 = vld [vmem:[#allocation11 + $0x1d8] sm:$0xff]  ;;  %v2002_v0 = vpack.c.bf16 %v215_v55, %v211_v54 }
  0xb0   :  { %1989 = vmatprep.subr.bf16.mxu0 %v1988_v17  ;;  %2239 = vmatpush1.bf16.msra.mxu1 %v2238_v20  ;;  %v218_v63 = vld [vmem:[#allocation11 + $0x1f8] sm:$0xff]  ;;  %v2004_v2 = vpack.c.bf16 %v224_v58, %v220_v57  ;;  %v219_v3 = vld [vmem:[#allocation11 + $0x200] sm:$0xff]  ;;  %v2254_v5 = vpack.c.bf16 %v209_v61, %v205_v60  ;;  %v228_v6 = vld [vmem:[#allocation11 + $0x248] sm:$0xff]  ;;  %v1247_v58 = vlaneseq }
  0xb1   :  { %2241 = vmatprep.subr.bf16.mxu1 %v2240_v23  ;;  %v223_v4 = vld [vmem:[#allocation11 + $0x220] sm:$0xff]  ;;  %v232_v7 = vld [vmem:[#allocation11 + $0x268] sm:$0xff]  ;;  %v2256_v8 = vpack.c.bf16 %v218_v63, %v214_v62  ;;  %v213_v1 = vld [vmem:[#allocation11 + $0x1d0] sm:$0xff] }
  0xb2   :  { %v217_v9 = vld [vmem:[#allocation11 + $0x1f0] sm:$0xff]  ;;  %v222_v10 = vld [vmem:[#allocation11 + $0x218] sm:$0xff]  ;;  %v2006_v12 = vpack.c.bf16 %v223_v4, %v219_v3  ;;  %v2008_v13 = vpack.c.bf16 %v232_v7, %v228_v6  ;;  %v227_v14 = vld [vmem:[#allocation11 + $0x240] sm:$0xff] }
  0xb3   :  { %1991 = vmatpush1.bf16.msra.mxu0 %v1990_v28  ;;  %v226_v11 = vld [vmem:[#allocation11 + $0x238] sm:$0xff]  ;;  %v231_v15 = vld [vmem:[#allocation11 + $0x260] sm:$0xff]  ;;  %v2258_v16 = vpack.c.bf16 %v217_v9, %v213_v1  ;;  %v236_v17 = vld [vmem:[#allocation11 + $0x288] sm:$0xff] }
  0xb4   :  { %1993 = vmatprep.subr.bf16.mxu0 %v1992_v29  ;;  %2243 = vmatpush1.bf16.msra.mxu1 %v2242_v32  ;;  %v240_v18 = vld [vmem:[#allocation11 + $0x2a8] sm:$0xff]  ;;  %v2260_v19 = vpack.c.bf16 %v226_v11, %v222_v10  ;;  %v221_v20 = vld [vmem:[#allocation11 + $0x210] sm:$0xff]  ;;  %v230_v22 = vld [vmem:[#allocation11 + $0x258] sm:$0xff]  ;;  %v2010_v24 = vpack.c.bf16 %v231_v15, %v227_v14 }
  0xb5   :  { %2245 = vmatprep.subr.bf16.mxu1 %v2244_v35  ;;  %v225_v21 = vld [vmem:[#allocation11 + $0x230] sm:$0xff]  ;;  %v234_v23 = vld [vmem:[#allocation11 + $0x278] sm:$0xff]  ;;  %v2012_v25 = vpack.c.bf16 %v240_v18, %v236_v17  ;;  %v235_v26 = vld [vmem:[#allocation11 + $0x280] sm:$0xff] }
  0xb6   :  { %v239_v27 = vld [vmem:[#allocation11 + $0x2a0] sm:$0xff]  ;;  %v2262_v28 = vpack.c.bf16 %v225_v21, %v221_v20  ;;  %v244_v29 = vld [vmem:[#allocation11 + $0x2c8] sm:$0xff]  ;;  %v2264_v31 = vpack.c.bf16 %v234_v23, %v230_v22  ;;  %v229_v32 = vld [vmem:[#allocation11 + $0x250] sm:$0xff] }
  0xb7   :  { %1995 = vmatpush1.bf16.msra.mxu0 %v1994_v40  ;;  %v248_v30 = vld [vmem:[#allocation11 + $0x2e8] sm:$0xff]  ;;  %v233_v33 = vld [vmem:[#allocation11 + $0x270] sm:$0xff]  ;;  %v238_v34 = vld [vmem:[#allocation11 + $0x298] sm:$0xff]  ;;  %v2014_v36 = vpack.c.bf16 %v239_v27, %v235_v26 }
  0xb8   :  { %1997 = vmatprep.subr.bf16.mxu0 %v1996_v41  ;;  %2247 = vmatpush1.bf16.msra.mxu1 %v2246_v44  ;;  %v242_v35 = vld [vmem:[#allocation11 + $0x2b8] sm:$0xff]  ;;  %v2016_v37 = vpack.c.bf16 %v248_v30, %v244_v29  ;;  %v243_v38 = vld [vmem:[#allocation11 + $0x2c0] sm:$0xff]  ;;  %v2266_v40 = vpack.c.bf16 %v233_v33, %v229_v32  ;;  %v252_v41 = vld [vmem:[#allocation11 + $0x308] sm:$0xff] }
  0xb9   :  { %2249 = vmatprep.subr.bf16.mxu1 %v2248_v47  ;;  %v247_v39 = vld [vmem:[#allocation11 + $0x2e0] sm:$0xff]  ;;  %v256_v42 = vld [vmem:[#allocation11 + $0x328] sm:$0xff]  ;;  %v2268_v43 = vpack.c.bf16 %v242_v35, %v238_v34  ;;  %v237_v44 = vld [vmem:[#allocation11 + $0x290] sm:$0xff] }
  0xba   :  { %v241_v45 = vld [vmem:[#allocation11 + $0x2b0] sm:$0xff]  ;;  %v246_v46 = vld [vmem:[#allocation11 + $0x2d8] sm:$0xff]  ;;  %v2018_v48 = vpack.c.bf16 %v247_v39, %v243_v38  ;;  %v2020_v49 = vpack.c.bf16 %v256_v42, %v252_v41  ;;  %v255_v60 = vld [vmem:[#allocation11 + $0x320] sm:$0xff] }
  0xbb   :  { %1999 = vmatpush1.bf16.msra.mxu0 %v1998_v52  ;;  %v250_v47 = vld [vmem:[#allocation11 + $0x2f8] sm:$0xff]  ;;  %v2270_v50 = vpack.c.bf16 %v241_v45, %v237_v44  ;;  %v245_v52 = vld [vmem:[#allocation11 + $0x2d0] sm:$0xff]  ;;  %v260_v3 = vld [vmem:[#allocation11 + $0x348] sm:$0xff] }
  0xbc   :  { %2001 = vmatprep.subr.bf16.mxu0 %v2000_v53  ;;  %2251 = vmatpush1.bf16.msra.mxu1 %v2250_v56  ;;  %v2272_v51 = vpack.c.bf16 %v250_v47, %v246_v46  ;;  %v249_v53 = vld [vmem:[#allocation11 + $0x2f0] sm:$0xff]  ;;  %v254_v54 = vld [vmem:[#allocation11 + $0x318] sm:$0xff]  ;;  %v264_v4 = vld [vmem:[#allocation11 + $0x368] sm:$0xff] }
  0xbd   :  { %2253 = vmatprep.subr.bf16.mxu1 %v2252_v59  ;;  %v258_v55 = vld [vmem:[#allocation11 + $0x338] sm:$0xff]  ;;  %v2274_v56 = vpack.c.bf16 %v249_v53, %v245_v52  ;;  %v251_v59 = vld [vmem:[#allocation11 + $0x300] sm:$0xff]  ;;  %v253_v61 = vld [vmem:[#allocation11 + $0x310] sm:$0xff]  ;;  %v2024_v6 = vpack.c.bf16 %v264_v4, %v260_v3 }
  0xbe   :  { %v2276_v57 = vpack.c.bf16 %v258_v55, %v254_v54  ;;  %v2022_v62 = vpack.c.bf16 %v255_v60, %v251_v59  ;;  %v257_v63 = vld [vmem:[#allocation11 + $0x330] sm:$0xff]  ;;  %v266_v7 = vld [vmem:[#allocation11 + $0x378] sm:$0xff]  ;;  %v259_v1 = vld [vmem:[#allocation11 + $0x340] sm:$0xff] }
  0xbf   :  { %2003 = vmatpush1.bf16.msra.mxu0 %v2002_v0  ;;  %v2915_v0 = vshrl.u32 %v1247_v58, 7  ;;  %v263_v9 = vld [vmem:[#allocation11 + $0x360] sm:$0xff]  ;;  %v2918_v10 = vld [vmem:[#allocation10] sm:$0xff]  ;;  %v265_v14 = vld [vmem:[#allocation11 + $0x370] sm:$0xff] }
  0xc0   :  { %2005 = vmatprep.subr.bf16.mxu0 %v2004_v2  ;;  %2255 = vmatpush1.bf16.msra.mxu1 %v2254_v5  ;;  %v2278_v2 = vpack.c.bf16 %v257_v63, %v253_v61  ;;  %v262_v5 = vld [vmem:[#allocation11 + $0x358] sm:$0xff]  ;;  %v272_v20 = vld [vmem:[#allocation11 + $0x3a8] sm:$0xff]  ;;  %v273_v29 = vld [vmem:[#allocation11 + $0x3b0] sm:$0xff] }
  0xc1   :  { %2257 = vmatprep.subr.bf16.mxu1 %v2256_v8  ;;  %v1265_v8 = vsub.s32 4, %v2915_v0  ;;  %v2280_v11 = vpack.c.bf16 %v266_v7, %v262_v5  ;;  %v1269_v15 = vsub.s32 5, %v2915_v0  ;;  %v270_v21 = vld [vmem:[#allocation11 + $0x398] sm:$0xff]  ;;  %v280_v32 = vld [vmem:[#allocation11 + $0x3e8] sm:$0xff]  ;;  %v281_v41 = vld [vmem:[#allocation11 + $0x3f0] sm:$0xff]  ;;  %v2932_v53 = vsub.s32 0, %v2915_v0 }
  0xc2   :  { %v274_v23 = vld [vmem:[#allocation11 + $0x3b8] sm:$0xff]  ;;  %v288_v44 = vld [vmem:[#allocation11 + $0x428] sm:$0xff]  ;;  %v2935_v54 = vsub.s32 1, %v2915_v0  ;;  %v2945_v59 = vsub.s32 3, %v2915_v0 }
  0xc3   :  { %2007 = vmatpush1.bf16.msra.mxu0 %v2006_v12  ;;  %v2026_v12 = vpack.c.bf16 %v263_v9, %v259_v1  ;;  %v2925_v18 = vrot.slane %v2918_v10, %v1269_v15  ;;  %v2284_v26 = vpack.c.bf16 %v274_v23, %v270_v21  ;;  %v278_v33 = vld [vmem:[#allocation11 + $0x3d8] sm:$0xff]  ;;  %v1250_v55 = vrot.slane %v2918_v10, %v2932_v53  ;;  %v283_v9 = vld [vmem:[#allocation11 + $0x400] sm:$0xff]  ;;  %v296_v15 = vld [vmem:[#allocation11 + $0x468] sm:$0xff] }
  0xc4   :  { %2009 = vmatprep.subr.bf16.mxu0 %v2008_v13  ;;  %2259 = vmatpush1.bf16.msra.mxu1 %v2258_v16  ;;  %v261_v13 = vld [vmem:[#allocation11 + $0x350] sm:$0xff]  ;;  %v2922_v16 = vrot.slane %v2918_v10, %v1265_v8  ;;  %v282_v35 = vld [vmem:[#allocation11 + $0x3f8] sm:$0xff]  ;;  %v1262_v3 = vrot.slane %v2918_v10, %v2945_v59  ;;  %v291_v23 = vld [vmem:[#allocation11 + $0x440] sm:$0xff] }
  0xc5   :  { %2261 = vmatprep.subr.bf16.mxu1 %v2260_v19  ;;  %v2282_v17 = vpack.c.bf16 %v265_v14, %v261_v13  ;;  %v268_v19 = vld [vmem:[#allocation11 + $0x388] sm:$0xff]  ;;  %v2288_v38 = vpack.c.bf16 %v282_v35, %v278_v33  ;;  %v286_v45 = vld [vmem:[#allocation11 + $0x418] sm:$0xff]  ;;  %v289_v13 = vld [vmem:[#allocation11 + $0x430] sm:$0xff] }
  0xc6   :  { %v2028_v22 = vpack.c.bf16 %v272_v20, %v268_v19  ;;  %v290_v47 = vld [vmem:[#allocation11 + $0x438] sm:$0xff]  ;;  %v292_v14 = vld [vmem:[#allocation11 + $0x448] sm:$0xff] }
  0xc7   :  { %2011 = vmatpush1.bf16.msra.mxu0 %v2010_v24  ;;  %v267_v24 = vld [vmem:[#allocation11 + $0x380] sm:$0xff]  ;;  %v302_v33 = vld [vmem:[#allocation11 + $0x498] sm:$0xff] }
  0xc8   :  { %2013 = vmatprep.subr.bf16.mxu0 %v2012_v25  ;;  %2263 = vmatpush1.bf16.msra.mxu1 %v2262_v28  ;;  %v271_v25 = vld [vmem:[#allocation11 + $0x3a0] sm:$0xff]  ;;  %v269_v28 = vld [vmem:[#allocation11 + $0x390] sm:$0xff] }
  0xc9   :  { %2265 = vmatprep.subr.bf16.mxu1 %v2264_v31  ;;  %v2030_v27 = vpack.c.bf16 %v271_v25, %v267_v24  ;;  %v2286_v30 = vpack.c.bf16 %v273_v29, %v269_v28  ;;  %v276_v31 = vld [vmem:[#allocation11 + $0x3c8] sm:$0xff]  ;;  %v295_v24 = vld [vmem:[#allocation11 + $0x460] sm:$0xff]  ;;  %v293_v28 = vld [vmem:[#allocation11 + $0x450] sm:$0xff] }
  0xca   :  { %v2032_v34 = vpack.c.bf16 %v280_v32, %v276_v31  ;;  %v297_v29 = vld [vmem:[#allocation11 + $0x470] sm:$0xff]  ;;  %v304_v32 = vld [vmem:[#allocation11 + $0x4a8] sm:$0xff]  ;;  %v2042_v35 = vpack.c.bf16 %v295_v24, %v291_v23 }
  0xcb   :  { %2015 = vmatpush1.bf16.msra.mxu0 %v2014_v36  ;;  %v275_v36 = vld [vmem:[#allocation11 + $0x3c0] sm:$0xff]  ;;  %v325_v23 = vld [vmem:[#allocation11 + $0x550] sm:$0xff] }
  0xcc   :  { %2017 = vmatprep.subr.bf16.mxu0 %v2016_v37  ;;  %2267 = vmatpush1.bf16.msra.mxu1 %v2266_v40  ;;  %v279_v37 = vld [vmem:[#allocation11 + $0x3e0] sm:$0xff]  ;;  %v277_v40 = vld [vmem:[#allocation11 + $0x3d0] sm:$0xff] }
  0xcd   :  { %2269 = vmatprep.subr.bf16.mxu1 %v2268_v43  ;;  %v2034_v39 = vpack.c.bf16 %v279_v37, %v275_v36  ;;  %v2290_v42 = vpack.c.bf16 %v281_v41, %v277_v40  ;;  %v284_v43 = vld [vmem:[#allocation11 + $0x408] sm:$0xff]  ;;  %v2298_v36 = vpack.c.bf16 %v297_v29, %v293_v28  ;;  %v299_v37 = vld [vmem:[#allocation11 + $0x480] sm:$0xff]  ;;  %v301_v41 = vld [vmem:[#allocation11 + $0x490] sm:$0xff] }
  0xce   :  { %v2036_v46 = vpack.c.bf16 %v288_v44, %v284_v43  ;;  %v308_v43 = vld [vmem:[#allocation11 + $0x4c8] sm:$0xff]  ;;  %v329_v24 = vld [vmem:[#allocation11 + $0x570] sm:$0xff]  ;;  %v338_v28 = vld [vmem:[#allocation11 + $0x5b8] sm:$0xff] }
  0xcf   :  { %2019 = vmatpush1.bf16.msra.mxu0 %v2018_v48  ;;  %v2292_v48 = vpack.c.bf16 %v290_v47, %v286_v45  ;;  %v312_v44 = vld [vmem:[#allocation11 + $0x4e8] sm:$0xff]  ;;  %v310_v45 = vld [vmem:[#allocation11 + $0x4d8] sm:$0xff] }
  0xd0   :  { %2021 = vmatprep.subr.bf16.mxu0 %v2020_v49  ;;  %2271 = vmatpush1.bf16.msra.mxu1 %v2270_v50  ;;  %v1273_v49 = vsub.s32 6, %v2915_v0  ;;  %v1277_v50 = vsub.s32 7, %v2915_v0 }
  0xd1   :  { %2273 = vmatprep.subr.bf16.mxu1 %v2272_v51 }
  0xd2   :  { %v1274_v51 = vrot.slane %v2918_v10, %v1273_v49  ;;  %v1278_v52 = vrot.slane %v2918_v10, %v1277_v50  ;;  %v307_v50 = vld [vmem:[#allocation11 + $0x4c0] sm:$0xff] }
  0xd3   :  { %2023 = vmatpush1.bf16.msra.mxu0 %v2022_v62 }
  0xd4   :  { %2275 = vmatpush1.bf16.msra.mxu1 %v2274_v56  ;;  %2025 = vmatprep.subr.bf16.mxu0 %v2024_v6  ;;  %v1254_v56 = vrot.slane %v2918_v10, %v2935_v54 }
  0xd5   :  { %2277 = vmatprep.subr.bf16.mxu1 %v2276_v57  ;;  %v2942_v57 = vsub.s32 2, %v2915_v0 }
  0xd7   :  { %2027 = vmatpush1.bf16.msra.mxu0 %v2026_v12  ;;  %v1258_v63 = vrot.slane %v2918_v10, %v2942_v57  ;;  %v285_v12 = vld [vmem:[#allocation11 + $0x410] sm:$0xff] }
  0xd8   :  { %2279 = vmatpush1.bf16.msra.mxu1 %v2278_v2  ;;  %2029 = vmatprep.subr.bf16.mxu0 %v2028_v22  ;;  %v2294_v22 = vpack.c.bf16 %v289_v13, %v285_v12  ;;  %v324_v12 = vld [vmem:[#allocation11 + $0x548] sm:$0xff] }
  0xd9   :  { %2281 = vmatprep.subr.bf16.mxu1 %v2280_v11  ;;  %v287_v11 = vld [vmem:[#allocation11 + $0x420] sm:$0xff]  ;;  %v328_v13 = vld [vmem:[#allocation11 + $0x568] sm:$0xff] }
  0xda   :  { %v2038_v21 = vpack.c.bf16 %v287_v11, %v283_v9  ;;  %v317_v9 = vld [vmem:[#allocation11 + $0x510] sm:$0xff] }
  0xdb   :  { %2031 = vmatpush1.bf16.msra.mxu0 %v2030_v27  ;;  %v321_v11 = vld [vmem:[#allocation11 + $0x530] sm:$0xff] }
  0xdc   :  { %2283 = vmatpush1.bf16.msra.mxu1 %v2282_v17  ;;  %2033 = vmatprep.subr.bf16.mxu0 %v2032_v34  ;;  %v294_v17 = vld [vmem:[#allocation11 + $0x458] sm:$0xff] }
  0xdd   :  { %2285 = vmatprep.subr.bf16.mxu1 %v2284_v26  ;;  %v2040_v26 = vpack.c.bf16 %v296_v15, %v292_v14  ;;  %v306_v34 = vld [vmem:[#allocation11 + $0x4b8] sm:$0xff] }
  0xde   :  { %v2300_v40 = vpack.c.bf16 %v306_v34, %v302_v33  ;;  %v326_v14 = vld [vmem:[#allocation11 + $0x558] sm:$0xff] }
  0xdf   :  { %2035 = vmatpush1.bf16.msra.mxu0 %v2034_v39 }
  0xe0   :  { %2287 = vmatpush1.bf16.msra.mxu1 %v2286_v30  ;;  %2037 = vmatprep.subr.bf16.mxu0 %v2036_v46  ;;  %v300_v30 = vld [vmem:[#allocation11 + $0x488] sm:$0xff]  ;;  %v314_v46 = vld [vmem:[#allocation11 + $0x4f8] sm:$0xff] }
  0xe1   :  { %2289 = vmatprep.subr.bf16.mxu1 %v2288_v38  ;;  %v303_v38 = vld [vmem:[#allocation11 + $0x4a0] sm:$0xff]  ;;  %v2044_v39 = vpack.c.bf16 %v304_v32, %v300_v30  ;;  %v2314_v30 = vpack.c.bf16 %v329_v24, %v325_v23 }
  0xe2   :  { %v335_v32 = vld [vmem:[#allocation11 + $0x5a0] sm:$0xff] }
  0xe3   :  { %v363_v24 = vld [vmem:[#allocation11 + $0x680] sm:$0xff] }
  0xe4   :  { %2291 = vmatpush1.bf16.msra.mxu1 %v2290_v42  ;;  %v305_v42 = vld [vmem:[#allocation11 + $0x4b0] sm:$0xff] }
  0xe5   :  { %2293 = vmatprep.subr.bf16.mxu1 %v2292_v48  ;;  %v2046_v48 = vpack.c.bf16 %v303_v38, %v299_v37  ;;  %v2302_v49 = vpack.c.bf16 %v305_v42, %v301_v41  ;;  %v340_v37 = vld [vmem:[#allocation11 + $0x5c8] sm:$0xff] }
  0xe6   :  { %v344_v38 = vld [vmem:[#allocation11 + $0x5e8] sm:$0xff] }
 0x171   :  { %v1027_v58 = vpop.f32.mrb[0].mxu0 }
 0x172   :  { %v1287_v60 = vadd.f32 %v1250_v55, %v1027_v58  ;;  %v1029_v61 = vpop.f32.mrb[1].mxu0  ;;  %v2304_v55 = vpack.c.bf16 %v314_v46, %v310_v45  ;;  %v313_v58 = vld [vmem:[#allocation11 + $0x4f0] sm:$0xff]  ;;  %v2064_v45 = vpack.c.bf16 %v344_v38, %v340_v37  ;;  %v375_v37 = vld [vmem:[#allocation11 + $0x6e0] sm:$0xff] }
 0x173   :  { %v1288_v62 = vadd.f32 %v1254_v56, %v1029_v61  ;;  %v309_v56 = vld [vmem:[#allocation11 + $0x4d0] sm:$0xff]  ;;  %v320_v61 = vld [vmem:[#allocation11 + $0x528] sm:$0xff] }
 0x175   :  { %2521 = vtanh.f32 %v1288_v62  ;;  %v1169_v2 = vpop.f32.mrb[2].mxu0  ;;  %v318_v62 = vld [vmem:[#allocation11 + $0x518] sm:$0xff] }
 0x176   :  { %2523 = vtanh.f32 %v1287_v60  ;;  %v2952_v4 = vadd.f32 %v2922_v16, %v1169_v2  ;;  %v1171_v5 = vpop.f32.mrb[3].mxu0  ;;  %v1098_v0 = vpop.f32.mrb[0].mxu1  ;;  %v298_v16 = vld [vmem:[#allocation11 + $0x478] sm:$0xff]  ;;  %v316_v60 = vld [vmem:[#allocation11 + $0x508] sm:$0xff] }
 0x177   :  { %v2955_v6 = vadd.f32 %v2925_v18, %v1171_v5  ;;  %v2957_v7 = vadd.f32 %v1258_v63, %v1098_v0  ;;  %v1100_v8 = vpop.f32.mrb[1].mxu1  ;;  %v2296_v27 = vpack.c.bf16 %v298_v16, %v294_v17  ;;  %v322_v63 = vld [vmem:[#allocation11 + $0x538] sm:$0xff]  ;;  %v315_v5 = vld [vmem:[#allocation11 + $0x500] sm:$0xff]  ;;  %v2310_v17 = vpack.c.bf16 %v321_v11, %v317_v9 }
 0x178   :  { %v1290_v1 = vadd.f32 %v1262_v3, %v1100_v8  ;;  %v2306_v3 = vpack.c.bf16 %v313_v58, %v309_v56  ;;  %v319_v0 = vld [vmem:[#allocation11 + $0x520] sm:$0xff]  ;;  %v2052_v8 = vpack.c.bf16 %v320_v61, %v316_v60 }
 0x179   :  { %v2054_v15 = vpack.c.bf16 %v319_v0, %v315_v5  ;;  %v323_v16 = vld [vmem:[#allocation11 + $0x540] sm:$0xff]  ;;  %v360_v5 = vld [vmem:[#allocation11 + $0x668] sm:$0xff]  ;;  %v358_v0 = vld [vmem:[#allocation11 + $0x658] sm:$0xff] }
 0x17a   :  { %2525 = vtanh.f32 %v1290_v1  ;;  %v1240_v10 = vpop.f32.mrb[2].mxu1  ;;  %v2308_v1 = vpack.c.bf16 %v322_v63, %v318_v62  ;;  %v347_v58 = vld [vmem:[#allocation11 + $0x600] sm:$0xff]  ;;  %v349_v63 = vld [vmem:[#allocation11 + $0x610] sm:$0xff] }
 0x17b   :  { %v2959_v19 = vadd.f32 %v1274_v51, %v1240_v10  ;;  %v1242_v20 = vpop.f32.mrb[3].mxu1  ;;  %v311_v51 = vld [vmem:[#allocation11 + $0x4e0] sm:$0xff]  ;;  %v330_v10 = vld [vmem:[#allocation11 + $0x578] sm:$0xff]  ;;  %2527 = vtanh.f32 %v2957_v7 }
 0x17c   :  { %v2961_v18 = vadd.f32 %v1278_v52, %v1242_v20  ;;  %v2048_v52 = vpack.c.bf16 %v312_v44, %v308_v43  ;;  %v2050_v2 = vpack.c.bf16 %v311_v51, %v307_v50  ;;  %v327_v20 = vld [vmem:[#allocation11 + $0x560] sm:$0xff]  ;;  %v352_v50 = vld [vmem:[#allocation11 + $0x628] sm:$0xff]  ;;  %v350_v51 = vld [vmem:[#allocation11 + $0x618] sm:$0xff]  ;;  %2529 = vtanh.f32 %v2955_v6 }
 0x17d   :  { %v2058_v29 = vpack.c.bf16 %v327_v20, %v323_v16  ;;  %v339_v43 = vld [vmem:[#allocation11 + $0x5c0] sm:$0xff]  ;;  %v368_v16 = vld [vmem:[#allocation11 + $0x6a8] sm:$0xff]  ;;  %v366_v20 = vld [vmem:[#allocation11 + $0x698] sm:$0xff]  ;;  %2531 = vtanh.f32 %v2952_v4 }
 0x17e   :  { %v343_v44 = vld [vmem:[#allocation11 + $0x5e0] sm:$0xff]  ;;  %2533 = vtanh.f32 %v2961_v18  ;;  %v548_v18 = vld [vmem:[#allocation11 + $0xc48] sm:$0xff] }
 0x17f   :  { %v2522_v25 = vpop.eup %2521  ;;  %v351_v60 = vld [vmem:[#allocation11 + $0x620] sm:$0xff]  ;;  %2535 = vtanh.f32 %v2959_v19 }
 0x180   :  { %v2524_v31 = vpop.eup %2523  ;;  %1389 = vmatprep.mubr.f32.mxu0 %v2522_v25  ;;  %1673 = vmatprep.mubr.f32.mxu1 %v2522_v25  ;;  %v332_v25 = vld [vmem:[#allocation11 + $0x588] sm:$0xff]  ;;  %v355_v11 = vld [vmem:[#allocation11 + $0x640] sm:$0xff] }
 0x181   :  { %1390 = vmatmul.mubr.f32.vlgmr.msra.gmra.mrb[4].mxu0 %v2524_v31  ;;  %1674 = vmatmul.mubr.f32.vlgmr.msra.gmra.mrb[4].mxu1 %v2524_v31  ;;  %v331_v31 = vld [vmem:[#allocation11 + $0x580] sm:$0xff] }
 0x182   :  { %2039 = vmatpush1.bf16.msra.mxu0 %v2038_v21  ;;  %2295 = vmatpush1.bf16.msra.mxu1 %v2294_v22  ;;  %v2056_v21 = vpack.c.bf16 %v328_v13, %v324_v12  ;;  %v2312_v22 = vpack.c.bf16 %v330_v10, %v326_v14  ;;  %v2062_v41 = vpack.c.bf16 %v335_v32, %v331_v31  ;;  %v359_v12 = vld [vmem:[#allocation11 + $0x660] sm:$0xff]  ;;  %v357_v10 = vld [vmem:[#allocation11 + $0x650] sm:$0xff]  ;;  %v376_v31 = vld [vmem:[#allocation11 + $0x6e8] sm:$0xff] }
 0x183   :  { %2041 = vmatprep.subr.bf16.mxu0 %v2040_v26  ;;  %2297 = vmatprep.subr.bf16.mxu1 %v2296_v27  ;;  %v336_v26 = vld [vmem:[#allocation11 + $0x5a8] sm:$0xff]  ;;  %v334_v27 = vld [vmem:[#allocation11 + $0x598] sm:$0xff]  ;;  %v415_v6 = vld [vmem:[#allocation11 + $0x820] sm:$0xff] }
 0x184   :  { %v2526_v47 = vpop.eup %2525  ;;  %v2060_v33 = vpack.c.bf16 %v336_v26, %v332_v25  ;;  %v2316_v34 = vpack.c.bf16 %v338_v28, %v334_v27  ;;  %v367_v25 = vld [vmem:[#allocation11 + $0x6a0] sm:$0xff]  ;;  %v365_v28 = vld [vmem:[#allocation11 + $0x690] sm:$0xff]  ;;  %v374_v32 = vld [vmem:[#allocation11 + $0x6d8] sm:$0xff] }
 0x185   :  { %1460 = vmatprep.mubr.f32.mxu0 %v2526_v47  ;;  %1744 = vmatprep.mubr.f32.mxu1 %v2526_v47  ;;  %v341_v47 = vld [vmem:[#allocation11 + $0x5d0] sm:$0xff] }
 0x186   :  { %2043 = vmatpush1.bf16.msra.mxu0 %v2042_v35  ;;  %2299 = vmatpush1.bf16.msra.mxu1 %v2298_v36  ;;  %v333_v35 = vld [vmem:[#allocation11 + $0x590] sm:$0xff] }
 0x187   :  { %2045 = vmatprep.subr.bf16.mxu0 %v2044_v39  ;;  %2301 = vmatprep.subr.bf16.mxu1 %v2300_v40  ;;  %v337_v36 = vld [vmem:[#allocation11 + $0x5b0] sm:$0xff]  ;;  %v342_v39 = vld [vmem:[#allocation11 + $0x5d8] sm:$0xff] }
 0x188   :  { %v346_v40 = vld [vmem:[#allocation11 + $0x5f8] sm:$0xff]  ;;  %v2318_v42 = vpack.c.bf16 %v337_v36, %v333_v35  ;;  %v371_v36 = vld [vmem:[#allocation11 + $0x6c0] sm:$0xff] }
 0x189   :  { %v2320_v46 = vpack.c.bf16 %v346_v40, %v342_v39  ;;  %v373_v40 = vld [vmem:[#allocation11 + $0x6d0] sm:$0xff] }
 0x18a   :  { %2047 = vmatpush1.bf16.msra.mxu0 %v2046_v48  ;;  %2303 = vmatpush1.bf16.msra.mxu1 %v2302_v49  ;;  %v345_v48 = vld [vmem:[#allocation11 + $0x5f0] sm:$0xff]  ;;  %v348_v49 = vld [vmem:[#allocation11 + $0x608] sm:$0xff] }
 0x18b   :  { %2049 = vmatprep.subr.bf16.mxu0 %v2048_v52  ;;  %2305 = vmatprep.subr.bf16.mxu1 %v2304_v55  ;;  %v354_v52 = vld [vmem:[#allocation11 + $0x638] sm:$0xff]  ;;  %v2066_v55 = vpack.c.bf16 %v343_v44, %v339_v43  ;;  %v2322_v56 = vpack.c.bf16 %v345_v48, %v341_v47  ;;  %v2068_v61 = vpack.c.bf16 %v352_v50, %v348_v49  ;;  %v384_v43 = vld [vmem:[#allocation11 + $0x728] sm:$0xff]  ;;  %v379_v48 = vld [vmem:[#allocation11 + $0x700] sm:$0xff] }
 0x18c   :  { %v2324_v62 = vpack.c.bf16 %v354_v52, %v350_v51  ;;  %v382_v44 = vld [vmem:[#allocation11 + $0x718] sm:$0xff]  ;;  %v383_v49 = vld [vmem:[#allocation11 + $0x720] sm:$0xff]  ;;  %v381_v52 = vld [vmem:[#allocation11 + $0x710] sm:$0xff] }
 0x18e   :  { %2051 = vmatpush1.bf16.msra.mxu0 %v2050_v2  ;;  %2307 = vmatpush1.bf16.msra.mxu1 %v2306_v3  ;;  %v353_v2 = vld [vmem:[#allocation11 + $0x630] sm:$0xff]  ;;  %v356_v3 = vld [vmem:[#allocation11 + $0x648] sm:$0xff] }
 0x18f   :  { %2053 = vmatprep.subr.bf16.mxu0 %v2052_v8  ;;  %2309 = vmatprep.subr.bf16.mxu1 %v2308_v1  ;;  %v362_v8 = vld [vmem:[#allocation11 + $0x678] sm:$0xff]  ;;  %v2070_v1 = vpack.c.bf16 %v351_v60, %v347_v58  ;;  %v2326_v9 = vpack.c.bf16 %v353_v2, %v349_v63  ;;  %v2072_v13 = vpack.c.bf16 %v360_v5, %v356_v3  ;;  %v392_v58 = vld [vmem:[#allocation11 + $0x768] sm:$0xff]  ;;  %v387_v2 = vld [vmem:[#allocation11 + $0x740] sm:$0xff] }
 0x190   :  { %v2328_v14 = vpack.c.bf16 %v362_v8, %v358_v0  ;;  %v390_v60 = vld [vmem:[#allocation11 + $0x758] sm:$0xff]  ;;  %v391_v3 = vld [vmem:[#allocation11 + $0x760] sm:$0xff]  ;;  %v389_v8 = vld [vmem:[#allocation11 + $0x750] sm:$0xff] }
 0x192   :  { %2055 = vmatpush1.bf16.msra.mxu0 %v2054_v15  ;;  %2311 = vmatpush1.bf16.msra.mxu1 %v2310_v17  ;;  %v361_v15 = vld [vmem:[#allocation11 + $0x670] sm:$0xff]  ;;  %v364_v17 = vld [vmem:[#allocation11 + $0x688] sm:$0xff] }
 0x193   :  { %2057 = vmatprep.subr.bf16.mxu0 %v2056_v21  ;;  %2313 = vmatprep.subr.bf16.mxu1 %v2312_v22  ;;  %v370_v21 = vld [vmem:[#allocation11 + $0x6b8] sm:$0xff]  ;;  %v2074_v22 = vpack.c.bf16 %v359_v12, %v355_v11  ;;  %v2330_v23 = vpack.c.bf16 %v361_v15, %v357_v10  ;;  %v2076_v26 = vpack.c.bf16 %v368_v16, %v364_v17  ;;  %v400_v11 = vld [vmem:[#allocation11 + $0x7a8] sm:$0xff]  ;;  %v395_v15 = vld [vmem:[#allocation11 + $0x780] sm:$0xff] }
 0x194   :  { %v2332_v27 = vpack.c.bf16 %v370_v21, %v366_v20  ;;  %v398_v12 = vld [vmem:[#allocation11 + $0x798] sm:$0xff]  ;;  %v399_v17 = vld [vmem:[#allocation11 + $0x7a0] sm:$0xff]  ;;  %v397_v21 = vld [vmem:[#allocation11 + $0x790] sm:$0xff] }
 0x196   :  { %2059 = vmatpush1.bf16.msra.mxu0 %v2058_v29  ;;  %2315 = vmatpush1.bf16.msra.mxu1 %v2314_v30  ;;  %v369_v29 = vld [vmem:[#allocation11 + $0x6b0] sm:$0xff]  ;;  %v372_v30 = vld [vmem:[#allocation11 + $0x6c8] sm:$0xff] }
 0x197   :  { %2061 = vmatprep.subr.bf16.mxu0 %v2060_v33  ;;  %2317 = vmatprep.subr.bf16.mxu1 %v2316_v34  ;;  %v378_v33 = vld [vmem:[#allocation11 + $0x6f8] sm:$0xff]  ;;  %v2078_v34 = vpack.c.bf16 %v367_v25, %v363_v24  ;;  %v2334_v35 = vpack.c.bf16 %v369_v29, %v365_v28  ;;  %v2080_v38 = vpack.c.bf16 %v376_v31, %v372_v30  ;;  %v408_v24 = vld [vmem:[#allocation11 + $0x7e8] sm:$0xff]  ;;  %v403_v29 = vld [vmem:[#allocation11 + $0x7c0] sm:$0xff] }
 0x198   :  { %v2336_v39 = vpack.c.bf16 %v378_v33, %v374_v32  ;;  %v406_v25 = vld [vmem:[#allocation11 + $0x7d8] sm:$0xff]  ;;  %v407_v30 = vld [vmem:[#allocation11 + $0x7e0] sm:$0xff]  ;;  %v405_v33 = vld [vmem:[#allocation11 + $0x7d0] sm:$0xff] }
 0x199   :  { %v2098_v7 = vpack.c.bf16 %v407_v30, %v403_v29  ;;  %v448_v29 = vld [vmem:[#allocation11 + $0x928] sm:$0xff]  ;;  %v446_v30 = vld [vmem:[#allocation11 + $0x918] sm:$0xff] }
 0x19a   :  { %2063 = vmatpush1.bf16.msra.mxu0 %v2062_v41  ;;  %2319 = vmatpush1.bf16.msra.mxu1 %v2318_v42  ;;  %v377_v41 = vld [vmem:[#allocation11 + $0x6f0] sm:$0xff]  ;;  %v380_v42 = vld [vmem:[#allocation11 + $0x708] sm:$0xff] }
 0x19b   :  { %2065 = vmatprep.subr.bf16.mxu0 %v2064_v45  ;;  %2321 = vmatprep.subr.bf16.mxu1 %v2320_v46  ;;  %v386_v45 = vld [vmem:[#allocation11 + $0x738] sm:$0xff]  ;;  %v2082_v46 = vpack.c.bf16 %v375_v37, %v371_v36  ;;  %v2338_v47 = vpack.c.bf16 %v377_v41, %v373_v40  ;;  %v2084_v50 = vpack.c.bf16 %v384_v43, %v380_v42  ;;  %v416_v36 = vld [vmem:[#allocation11 + $0x828] sm:$0xff]  ;;  %v411_v42 = vld [vmem:[#allocation11 + $0x800] sm:$0xff] }
 0x19c   :  { %v2340_v51 = vpack.c.bf16 %v386_v45, %v382_v44  ;;  %v414_v37 = vld [vmem:[#allocation11 + $0x818] sm:$0xff]  ;;  %v413_v43 = vld [vmem:[#allocation11 + $0x810] sm:$0xff]  ;;  %v420_v45 = vld [vmem:[#allocation11 + $0x848] sm:$0xff] }
 0x19d   :  { %v417_v44 = vld [vmem:[#allocation11 + $0x830] sm:$0xff] }
 0x19e   :  { %2067 = vmatpush1.bf16.msra.mxu0 %v2066_v55  ;;  %2323 = vmatpush1.bf16.msra.mxu1 %v2322_v56  ;;  %v385_v55 = vld [vmem:[#allocation11 + $0x730] sm:$0xff]  ;;  %v388_v56 = vld [vmem:[#allocation11 + $0x748] sm:$0xff] }
 0x19f   :  { %2069 = vmatprep.subr.bf16.mxu0 %v2068_v61  ;;  %2325 = vmatprep.subr.bf16.mxu1 %v2324_v62  ;;  %v394_v61 = vld [vmem:[#allocation11 + $0x778] sm:$0xff]  ;;  %v2086_v62 = vpack.c.bf16 %v383_v49, %v379_v48  ;;  %v2342_v63 = vpack.c.bf16 %v385_v55, %v381_v52  ;;  %v2088_v5 = vpack.c.bf16 %v392_v58, %v388_v56  ;;  %v423_v52 = vld [vmem:[#allocation11 + $0x860] sm:$0xff]  ;;  %v421_v55 = vld [vmem:[#allocation11 + $0x850] sm:$0xff]  ;;  %v2528_v56 = vpop.eup %2527 }
 0x1a0   :  { %v2344_v0 = vpack.c.bf16 %v394_v61, %v390_v60  ;;  %v426_v48 = vld [vmem:[#allocation11 + $0x878] sm:$0xff]  ;;  %v2102_v49 = vpack.c.bf16 %v415_v6, %v411_v42  ;;  %v425_v61 = vld [vmem:[#allocation11 + $0x870] sm:$0xff] }
 0x1a1   :  { %v458_v42 = vld [vmem:[#allocation11 + $0x978] sm:$0xff] }
 0x1a2   :  { %2071 = vmatpush1.bf16.msra.mxu0 %v2070_v1  ;;  %2327 = vmatpush1.bf16.msra.mxu1 %v2326_v9  ;;  %v393_v1 = vld [vmem:[#allocation11 + $0x770] sm:$0xff]  ;;  %v396_v9 = vld [vmem:[#allocation11 + $0x788] sm:$0xff] }
 0x1a3   :  { %2073 = vmatprep.subr.bf16.mxu0 %v2072_v13  ;;  %2329 = vmatprep.subr.bf16.mxu1 %v2328_v14  ;;  %v402_v13 = vld [vmem:[#allocation11 + $0x7b8] sm:$0xff]  ;;  %v2090_v14 = vpack.c.bf16 %v391_v3, %v387_v2  ;;  %v2346_v10 = vpack.c.bf16 %v393_v1, %v389_v8  ;;  %v2092_v16 = vpack.c.bf16 %v400_v11, %v396_v9  ;;  %v2530_v2 = vpop.eup %2529  ;;  %v427_v9 = vld [vmem:[#allocation11 + $0x880] sm:$0xff] }
 0x1a4   :  { %v2348_v20 = vpack.c.bf16 %v402_v13, %v398_v12  ;;  %v430_v3 = vld [vmem:[#allocation11 + $0x898] sm:$0xff]  ;;  %v2362_v8 = vpack.c.bf16 %v425_v61, %v421_v55  ;;  %v431_v11 = vld [vmem:[#allocation11 + $0x8a0] sm:$0xff]  ;;  %v429_v12 = vld [vmem:[#allocation11 + $0x890] sm:$0xff] }
 0x1a5   :  { %v466_v55 = vld [vmem:[#allocation11 + $0x9b8] sm:$0xff]  ;;  %v459_v61 = vld [vmem:[#allocation11 + $0x980] sm:$0xff] }
 0x1a6   :  { %2075 = vmatpush1.bf16.msra.mxu0 %v2074_v22  ;;  %2331 = vmatpush1.bf16.msra.mxu1 %v2330_v23  ;;  %v401_v22 = vld [vmem:[#allocation11 + $0x7b0] sm:$0xff]  ;;  %v404_v23 = vld [vmem:[#allocation11 + $0x7c8] sm:$0xff] }
 0x1a7   :  { %2077 = vmatprep.subr.bf16.mxu0 %v2076_v26  ;;  %2333 = vmatprep.subr.bf16.mxu1 %v2332_v27  ;;  %v410_v26 = vld [vmem:[#allocation11 + $0x7f8] sm:$0xff]  ;;  %v2094_v27 = vpack.c.bf16 %v399_v17, %v395_v15  ;;  %v2350_v28 = vpack.c.bf16 %v401_v22, %v397_v21  ;;  %v2096_v31 = vpack.c.bf16 %v408_v24, %v404_v23  ;;  %v440_v15 = vld [vmem:[#allocation11 + $0x8e8] sm:$0xff]  ;;  %v435_v23 = vld [vmem:[#allocation11 + $0x8c0] sm:$0xff] }
 0x1a8   :  { %v2352_v32 = vpack.c.bf16 %v410_v26, %v406_v25  ;;  %v438_v17 = vld [vmem:[#allocation11 + $0x8d8] sm:$0xff]  ;;  %v439_v24 = vld [vmem:[#allocation11 + $0x8e0] sm:$0xff]  ;;  %v437_v25 = vld [vmem:[#allocation11 + $0x8d0] sm:$0xff] }
 0x1aa   :  { %2079 = vmatpush1.bf16.msra.mxu0 %v2078_v34  ;;  %2335 = vmatpush1.bf16.msra.mxu1 %v2334_v35  ;;  %v409_v34 = vld [vmem:[#allocation11 + $0x7f0] sm:$0xff]  ;;  %v412_v35 = vld [vmem:[#allocation11 + $0x808] sm:$0xff] }
 0x1ab   :  { %2081 = vmatprep.subr.bf16.mxu0 %v2080_v38  ;;  %2337 = vmatprep.subr.bf16.mxu1 %v2336_v39  ;;  %v418_v38 = vld [vmem:[#allocation11 + $0x838] sm:$0xff]  ;;  %v2354_v39 = vpack.c.bf16 %v409_v34, %v405_v33  ;;  %v2100_v40 = vpack.c.bf16 %v416_v36, %v412_v35  ;;  %v443_v35 = vld [vmem:[#allocation11 + $0x900] sm:$0xff] }
 0x1ac   :  { %v2356_v41 = vpack.c.bf16 %v418_v38, %v414_v37  ;;  %v447_v36 = vld [vmem:[#allocation11 + $0x920] sm:$0xff]  ;;  %v445_v37 = vld [vmem:[#allocation11 + $0x910] sm:$0xff] }
 0x1ad   :  { %v2118_v6 = vpack.c.bf16 %v447_v36, %v443_v35 }
 0x1ae   :  { %2083 = vmatpush1.bf16.msra.mxu0 %v2082_v46  ;;  %2339 = vmatpush1.bf16.msra.mxu1 %v2338_v47  ;;  %v424_v46 = vld [vmem:[#allocation11 + $0x868] sm:$0xff]  ;;  %v422_v47 = vld [vmem:[#allocation11 + $0x858] sm:$0xff] }
 0x1af   :  { %2085 = vmatprep.subr.bf16.mxu0 %v2084_v50  ;;  %2341 = vmatprep.subr.bf16.mxu1 %v2340_v51  ;;  %v2358_v50 = vpack.c.bf16 %v417_v44, %v413_v43  ;;  %v419_v51 = vld [vmem:[#allocation11 + $0x840] sm:$0xff]  ;;  %v2104_v58 = vpack.c.bf16 %v424_v46, %v420_v45  ;;  %v2360_v60 = vpack.c.bf16 %v426_v48, %v422_v47  ;;  %v453_v47 = vld [vmem:[#allocation11 + $0x950] sm:$0xff] }
 0x1b0   :  { %v451_v45 = vld [vmem:[#allocation11 + $0x940] sm:$0xff] }
 0x1b1   :  { %v455_v46 = vld [vmem:[#allocation11 + $0x960] sm:$0xff] }
 0x1b2   :  { %2087 = vmatpush1.bf16.msra.mxu0 %v2086_v62  ;;  %2343 = vmatpush1.bf16.msra.mxu1 %v2342_v63  ;;  %v428_v62 = vld [vmem:[#allocation11 + $0x888] sm:$0xff] }
 0x1b3   :  { %2089 = vmatprep.subr.bf16.mxu0 %v2088_v5  ;;  %2345 = vmatprep.subr.bf16.mxu1 %v2344_v0  ;;  %v432_v63 = vld [vmem:[#allocation11 + $0x8a8] sm:$0xff]  ;;  %v434_v5 = vld [vmem:[#allocation11 + $0x8b8] sm:$0xff]  ;;  %v2106_v0 = vpack.c.bf16 %v423_v52, %v419_v51 }
 0x1b4   :  { %v2108_v1 = vpack.c.bf16 %v432_v63, %v428_v62  ;;  %v2364_v13 = vpack.c.bf16 %v434_v5, %v430_v3  ;;  %v464_v51 = vld [vmem:[#allocation11 + $0x9a8] sm:$0xff]  ;;  %v462_v52 = vld [vmem:[#allocation11 + $0x998] sm:$0xff]  ;;  %v463_v62 = vld [vmem:[#allocation11 + $0x9a0] sm:$0xff] }
 0x1b5   :  { %v461_v63 = vld [vmem:[#allocation11 + $0x990] sm:$0xff]  ;;  %v468_v5 = vld [vmem:[#allocation11 + $0x9c8] sm:$0xff] }
 0x1b6   :  { %2091 = vmatpush1.bf16.msra.mxu0 %v2090_v14  ;;  %2347 = vmatpush1.bf16.msra.mxu1 %v2346_v10  ;;  %v433_v14 = vld [vmem:[#allocation11 + $0x8b0] sm:$0xff]  ;;  %v436_v10 = vld [vmem:[#allocation11 + $0x8c8] sm:$0xff] }
 0x1b7   :  { %2093 = vmatprep.subr.bf16.mxu0 %v2092_v16  ;;  %2349 = vmatprep.subr.bf16.mxu1 %v2348_v20  ;;  %v442_v16 = vld [vmem:[#allocation11 + $0x8f8] sm:$0xff]  ;;  %v2110_v20 = vpack.c.bf16 %v431_v11, %v427_v9  ;;  %v2366_v21 = vpack.c.bf16 %v433_v14, %v429_v12  ;;  %v2112_v22 = vpack.c.bf16 %v440_v15, %v436_v10  ;;  %v465_v3 = vld [vmem:[#allocation11 + $0x9b0] sm:$0xff]  ;;  %v471_v14 = vld [vmem:[#allocation11 + $0x9e0] sm:$0xff] }
 0x1b8   :  { %v2368_v26 = vpack.c.bf16 %v442_v16, %v438_v17  ;;  %v2126_v9 = vpack.c.bf16 %v463_v62, %v459_v61  ;;  %v2382_v11 = vpack.c.bf16 %v465_v3, %v461_v63  ;;  %v469_v10 = vld [vmem:[#allocation11 + $0x9d0] sm:$0xff]  ;;  %v476_v16 = vld [vmem:[#allocation11 + $0xa08] sm:$0xff]  ;;  %v503_v3 = vld [vmem:[#allocation11 + $0xae0] sm:$0xff] }
 0x1b9   :  { %v473_v17 = vld [vmem:[#allocation11 + $0x9f0] sm:$0xff] }
 0x1ba   :  { %2095 = vmatpush1.bf16.msra.mxu0 %v2094_v27  ;;  %2351 = vmatpush1.bf16.msra.mxu1 %v2350_v28  ;;  %v441_v27 = vld [vmem:[#allocation11 + $0x8f0] sm:$0xff]  ;;  %v444_v28 = vld [vmem:[#allocation11 + $0x908] sm:$0xff] }
 0x1bb   :  { %2097 = vmatprep.subr.bf16.mxu0 %v2096_v31  ;;  %2353 = vmatprep.subr.bf16.mxu1 %v2352_v32  ;;  %v450_v31 = vld [vmem:[#allocation11 + $0x938] sm:$0xff]  ;;  %v2114_v32 = vpack.c.bf16 %v439_v24, %v435_v23  ;;  %v2370_v33 = vpack.c.bf16 %v441_v27, %v437_v25  ;;  %v2116_v34 = vpack.c.bf16 %v448_v29, %v444_v28  ;;  %v479_v27 = vld [vmem:[#allocation11 + $0xa20] sm:$0xff]  ;;  %v477_v28 = vld [vmem:[#allocation11 + $0xa10] sm:$0xff] }
 0x1bc   :  { %v2372_v38 = vpack.c.bf16 %v450_v31, %v446_v30  ;;  %v2386_v24 = vpack.c.bf16 %v473_v17, %v469_v10  ;;  %v481_v30 = vld [vmem:[#allocation11 + $0xa30] sm:$0xff]  ;;  %v484_v31 = vld [vmem:[#allocation11 + $0xa48] sm:$0xff]  ;;  %v511_v17 = vld [vmem:[#allocation11 + $0xb20] sm:$0xff] }
 0x1bd   :  { %v2390_v36 = vpack.c.bf16 %v481_v30, %v477_v28  ;;  %v519_v30 = vld [vmem:[#allocation11 + $0xb60] sm:$0xff] }
 0x1be   :  { %2099 = vmatpush1.bf16.msra.mxu0 %v2098_v7  ;;  %2355 = vmatpush1.bf16.msra.mxu1 %v2354_v39  ;;  %v449_v7 = vld [vmem:[#allocation11 + $0x930] sm:$0xff]  ;;  %v452_v39 = vld [vmem:[#allocation11 + $0x948] sm:$0xff] }
 0x1bf   :  { %2101 = vmatprep.subr.bf16.mxu0 %v2100_v40  ;;  %2357 = vmatprep.subr.bf16.mxu1 %v2356_v41  ;;  %v456_v40 = vld [vmem:[#allocation11 + $0x968] sm:$0xff]  ;;  %v454_v41 = vld [vmem:[#allocation11 + $0x958] sm:$0xff]  ;;  %v2374_v43 = vpack.c.bf16 %v449_v7, %v445_v37  ;;  %v487_v7 = vld [vmem:[#allocation11 + $0xa60] sm:$0xff] }
 0x1c0   :  { %v2120_v44 = vpack.c.bf16 %v456_v40, %v452_v39  ;;  %v2376_v48 = vpack.c.bf16 %v458_v42, %v454_v41  ;;  %v485_v39 = vld [vmem:[#allocation11 + $0xa50] sm:$0xff]  ;;  %v492_v42 = vld [vmem:[#allocation11 + $0xa88] sm:$0xff] }
 0x1c1   :  { %1461 = vmatmul.mubr.f32.vlgmr.msra.gmra.mrb[4].mxu0 %v2528_v56  ;;  %1745 = vmatmul.mubr.f32.vlgmr.msra.gmra.mrb[4].mxu1 %v2528_v56  ;;  %v2122_v56 = vpack.c.bf16 %v455_v46, %v451_v45  ;;  %v489_v41 = vld [vmem:[#allocation11 + $0xa70] sm:$0xff] }
 0x1c2   :  { %2103 = vmatpush1.bf16.msra.mxu0 %v2102_v49  ;;  %1531 = vmatprep.mubr.f32.mxu0 %v2530_v2  ;;  %v457_v49 = vld [vmem:[#allocation11 + $0x970] sm:$0xff]  ;;  %v2394_v46 = vpack.c.bf16 %v489_v41, %v485_v39  ;;  %v527_v41 = vld [vmem:[#allocation11 + $0xba0] sm:$0xff] }
 0x1c3   :  { %2359 = vmatpush1.bf16.msra.mxu1 %v2358_v50  ;;  %1815 = vmatprep.mubr.f32.mxu1 %v2530_v2  ;;  %v460_v50 = vld [vmem:[#allocation11 + $0x988] sm:$0xff]  ;;  %v2380_v2 = vpack.c.bf16 %v466_v55, %v462_v52  ;;  %v497_v52 = vld [vmem:[#allocation11 + $0xab0] sm:$0xff] }
 0x1c4   :  { %2105 = vmatprep.subr.bf16.mxu0 %v2104_v58  ;;  %2361 = vmatprep.subr.bf16.mxu1 %v2360_v60  ;;  %v2378_v58 = vpack.c.bf16 %v457_v49, %v453_v47  ;;  %v2124_v60 = vpack.c.bf16 %v464_v51, %v460_v50  ;;  %v495_v49 = vld [vmem:[#allocation11 + $0xaa0] sm:$0xff]  ;;  %v493_v50 = vld [vmem:[#allocation11 + $0xa90] sm:$0xff]  ;;  %v500_v55 = vld [vmem:[#allocation11 + $0xac8] sm:$0xff] }
 0x1c5   :  { %v2398_v62 = vpack.c.bf16 %v497_v52, %v493_v50  ;;  %v535_v52 = vld [vmem:[#allocation11 + $0xbe0] sm:$0xff] }
 0x1c6   :  { %2107 = vmatpush1.bf16.msra.mxu0 %v2106_v0  ;;  %v472_v0 = vld [vmem:[#allocation11 + $0x9e8] sm:$0xff] }
 0x1c7   :  { %2363 = vmatpush1.bf16.msra.mxu1 %v2362_v8  ;;  %2109 = vmatprep.subr.bf16.mxu0 %v2108_v1  ;;  %v470_v8 = vld [vmem:[#allocation11 + $0x9d8] sm:$0xff]  ;;  %v2128_v12 = vpack.c.bf16 %v472_v0, %v468_v5  ;;  %v501_v5 = vld [vmem:[#allocation11 + $0xad0] sm:$0xff] }
 0x1c8   :  { %2365 = vmatprep.subr.bf16.mxu1 %v2364_v13  ;;  %v474_v1 = vld [vmem:[#allocation11 + $0x9f8] sm:$0xff]  ;;  %v467_v13 = vld [vmem:[#allocation11 + $0x9c0] sm:$0xff] }
 0x1c9   :  { %v2384_v15 = vpack.c.bf16 %v474_v1, %v470_v8  ;;  %v2130_v23 = vpack.c.bf16 %v471_v14, %v467_v13  ;;  %v505_v8 = vld [vmem:[#allocation11 + $0xaf0] sm:$0xff]  ;;  %v508_v1 = vld [vmem:[#allocation11 + $0xb08] sm:$0xff] }
 0x1ca   :  { %2111 = vmatpush1.bf16.msra.mxu0 %v2110_v20  ;;  %v480_v20 = vld [vmem:[#allocation11 + $0xa28] sm:$0xff]  ;;  %v2402_v14 = vpack.c.bf16 %v505_v8, %v501_v5  ;;  %v539_v5 = vld [vmem:[#allocation11 + $0xc00] sm:$0xff] }
 0x1cb   :  { %2367 = vmatpush1.bf16.msra.mxu1 %v2366_v21  ;;  %2113 = vmatprep.subr.bf16.mxu0 %v2112_v22  ;;  %v478_v21 = vld [vmem:[#allocation11 + $0xa18] sm:$0xff]  ;;  %v2132_v25 = vpack.c.bf16 %v480_v20, %v476_v16  ;;  %v509_v16 = vld [vmem:[#allocation11 + $0xb10] sm:$0xff] }
 0x1cc   :  { %2369 = vmatprep.subr.bf16.mxu1 %v2368_v26  ;;  %v482_v22 = vld [vmem:[#allocation11 + $0xa38] sm:$0xff]  ;;  %v475_v26 = vld [vmem:[#allocation11 + $0xa00] sm:$0xff] }
 0x1cd   :  { %v2388_v29 = vpack.c.bf16 %v482_v22, %v478_v21  ;;  %v2134_v35 = vpack.c.bf16 %v479_v27, %v475_v26  ;;  %v513_v21 = vld [vmem:[#allocation11 + $0xb30] sm:$0xff]  ;;  %v516_v22 = vld [vmem:[#allocation11 + $0xb48] sm:$0xff] }
 0x1ce   :  { %2115 = vmatpush1.bf16.msra.mxu0 %v2114_v32  ;;  %v488_v32 = vld [vmem:[#allocation11 + $0xa68] sm:$0xff]  ;;  %v2406_v27 = vpack.c.bf16 %v513_v21, %v509_v16  ;;  %v549_v16 = vld [vmem:[#allocation11 + $0xc50] sm:$0xff] }
 0x1cf   :  { %2371 = vmatpush1.bf16.msra.mxu1 %v2370_v33  ;;  %2117 = vmatprep.subr.bf16.mxu0 %v2116_v34  ;;  %v486_v33 = vld [vmem:[#allocation11 + $0xa58] sm:$0xff]  ;;  %v2136_v37 = vpack.c.bf16 %v488_v32, %v484_v31  ;;  %v517_v31 = vld [vmem:[#allocation11 + $0xb50] sm:$0xff] }
 0x1d0   :  { %2373 = vmatprep.subr.bf16.mxu1 %v2372_v38  ;;  %v490_v34 = vld [vmem:[#allocation11 + $0xa78] sm:$0xff]  ;;  %v483_v38 = vld [vmem:[#allocation11 + $0xa40] sm:$0xff] }
 0x1d1   :  { %v2392_v40 = vpack.c.bf16 %v490_v34, %v486_v33  ;;  %v2138_v45 = vpack.c.bf16 %v487_v7, %v483_v38  ;;  %v521_v33 = vld [vmem:[#allocation11 + $0xb70] sm:$0xff]  ;;  %v524_v34 = vld [vmem:[#allocation11 + $0xb88] sm:$0xff] }
 0x1d2   :  { %2119 = vmatpush1.bf16.msra.mxu0 %v2118_v6  ;;  %v496_v6 = vld [vmem:[#allocation11 + $0xaa8] sm:$0xff]  ;;  %v2410_v7 = vpack.c.bf16 %v521_v33, %v517_v31  ;;  %v559_v33 = vld [vmem:[#allocation11 + $0xca0] sm:$0xff] }
 0x1d3   :  { %2375 = vmatpush1.bf16.msra.mxu1 %v2374_v43  ;;  %2121 = vmatprep.subr.bf16.mxu0 %v2120_v44  ;;  %v494_v43 = vld [vmem:[#allocation11 + $0xa98] sm:$0xff]  ;;  %v2140_v47 = vpack.c.bf16 %v496_v6, %v492_v42  ;;  %v525_v42 = vld [vmem:[#allocation11 + $0xb90] sm:$0xff] }
 0x1d4   :  { %2377 = vmatprep.subr.bf16.mxu1 %v2376_v48  ;;  %v498_v44 = vld [vmem:[#allocation11 + $0xab8] sm:$0xff]  ;;  %v491_v48 = vld [vmem:[#allocation11 + $0xa80] sm:$0xff] }
 0x1d5   :  { %v2396_v51 = vpack.c.bf16 %v498_v44, %v494_v43  ;;  %v2142_v61 = vpack.c.bf16 %v495_v49, %v491_v48  ;;  %v529_v43 = vld [vmem:[#allocation11 + $0xbb0] sm:$0xff]  ;;  %v532_v44 = vld [vmem:[#allocation11 + $0xbc8] sm:$0xff] }
 0x1d6   :  { %2123 = vmatpush1.bf16.msra.mxu0 %v2122_v56  ;;  %v504_v56 = vld [vmem:[#allocation11 + $0xae8] sm:$0xff]  ;;  %v2414_v49 = vpack.c.bf16 %v529_v43, %v525_v42  ;;  %v567_v43 = vld [vmem:[#allocation11 + $0xce0] sm:$0xff] }
 0x1d7   :  { %2379 = vmatpush1.bf16.msra.mxu1 %v2378_v58  ;;  %2125 = vmatprep.subr.bf16.mxu0 %v2124_v60  ;;  %v502_v58 = vld [vmem:[#allocation11 + $0xad8] sm:$0xff]  ;;  %v2144_v63 = vpack.c.bf16 %v504_v56, %v500_v55  ;;  %v533_v55 = vld [vmem:[#allocation11 + $0xbd0] sm:$0xff] }
 0x1d8   :  { %2381 = vmatprep.subr.bf16.mxu1 %v2380_v2  ;;  %v506_v60 = vld [vmem:[#allocation11 + $0xaf8] sm:$0xff]  ;;  %v499_v2 = vld [vmem:[#allocation11 + $0xac0] sm:$0xff] }
 0x1d9   :  { %v2400_v0 = vpack.c.bf16 %v506_v60, %v502_v58  ;;  %v2146_v13 = vpack.c.bf16 %v503_v3, %v499_v2  ;;  %v537_v58 = vld [vmem:[#allocation11 + $0xbf0] sm:$0xff]  ;;  %v540_v60 = vld [vmem:[#allocation11 + $0xc08] sm:$0xff] }
 0x1da   :  { %2127 = vmatpush1.bf16.msra.mxu0 %v2126_v9  ;;  %v512_v9 = vld [vmem:[#allocation11 + $0xb28] sm:$0xff]  ;;  %v2418_v2 = vpack.c.bf16 %v537_v58, %v533_v55  ;;  %v575_v58 = vld [vmem:[#allocation11 + $0xd20] sm:$0xff] }
 0x1db   :  { %2383 = vmatpush1.bf16.msra.mxu1 %v2382_v11  ;;  %2129 = vmatprep.subr.bf16.mxu0 %v2128_v12  ;;  %v510_v11 = vld [vmem:[#allocation11 + $0xb18] sm:$0xff]  ;;  %v2148_v10 = vpack.c.bf16 %v512_v9, %v508_v1  ;;  %v541_v1 = vld [vmem:[#allocation11 + $0xc10] sm:$0xff] }
 0x1dc   :  { %2385 = vmatprep.subr.bf16.mxu1 %v2384_v15  ;;  %v514_v12 = vld [vmem:[#allocation11 + $0xb38] sm:$0xff]  ;;  %v507_v15 = vld [vmem:[#allocation11 + $0xb00] sm:$0xff]  ;;  %v545_v9 = vld [vmem:[#allocation11 + $0xc30] sm:$0xff] }
 0x1dd   :  { %v2404_v20 = vpack.c.bf16 %v514_v12, %v510_v11  ;;  %v2150_v26 = vpack.c.bf16 %v511_v17, %v507_v15  ;;  %v552_v11 = vld [vmem:[#allocation11 + $0xc68] sm:$0xff]  ;;  %v547_v15 = vld [vmem:[#allocation11 + $0xc40] sm:$0xff] }
 0x1de   :  { %2131 = vmatpush1.bf16.msra.mxu0 %v2130_v23  ;;  %v520_v23 = vld [vmem:[#allocation11 + $0xb68] sm:$0xff]  ;;  %v551_v17 = vld [vmem:[#allocation11 + $0xc60] sm:$0xff]  ;;  %v2168_v21 = vpack.c.bf16 %v552_v11, %v548_v18  ;;  %v581_v18 = vld [vmem:[#allocation11 + $0xd50] sm:$0xff] }
 0x1df   :  { %2387 = vmatpush1.bf16.msra.mxu1 %v2386_v24  ;;  %2133 = vmatprep.subr.bf16.mxu0 %v2132_v25  ;;  %v518_v24 = vld [vmem:[#allocation11 + $0xb58] sm:$0xff]  ;;  %v2152_v28 = vpack.c.bf16 %v520_v23, %v516_v22  ;;  %v553_v22 = vld [vmem:[#allocation11 + $0xc70] sm:$0xff]  ;;  %v556_v23 = vld [vmem:[#allocation11 + $0xc88] sm:$0xff] }
 0x1e0   :  { %2389 = vmatprep.subr.bf16.mxu1 %v2388_v29  ;;  %v522_v25 = vld [vmem:[#allocation11 + $0xb78] sm:$0xff]  ;;  %v515_v29 = vld [vmem:[#allocation11 + $0xb40] sm:$0xff] }
 0x1e1   :  { %v2408_v32 = vpack.c.bf16 %v522_v25, %v518_v24  ;;  %v2154_v38 = vpack.c.bf16 %v519_v30, %v515_v29  ;;  %v560_v24 = vld [vmem:[#allocation11 + $0xca8] sm:$0xff]  ;;  %v2170_v29 = vpack.c.bf16 %v551_v17, %v547_v15  ;;  %v2426_v30 = vpack.c.bf16 %v553_v22, %v549_v16  ;;  %v594_v15 = vld [vmem:[#allocation11 + $0xdb8] sm:$0xff]  ;;  %v591_v22 = vld [vmem:[#allocation11 + $0xda0] sm:$0xff] }
 0x1e2   :  { %2135 = vmatpush1.bf16.msra.mxu0 %v2134_v35  ;;  %v528_v35 = vld [vmem:[#allocation11 + $0xba8] sm:$0xff]  ;;  %v2172_v31 = vpack.c.bf16 %v560_v24, %v556_v23  ;;  %v589_v23 = vld [vmem:[#allocation11 + $0xd90] sm:$0xff] }
 0x1e3   :  { %2391 = vmatpush1.bf16.msra.mxu1 %v2390_v36  ;;  %2137 = vmatprep.subr.bf16.mxu0 %v2136_v37  ;;  %v526_v36 = vld [vmem:[#allocation11 + $0xb98] sm:$0xff]  ;;  %v2156_v39 = vpack.c.bf16 %v528_v35, %v524_v34  ;;  %v557_v34 = vld [vmem:[#allocation11 + $0xc90] sm:$0xff] }
 0x1e4   :  { %2393 = vmatprep.subr.bf16.mxu1 %v2392_v40  ;;  %v530_v37 = vld [vmem:[#allocation11 + $0xbb8] sm:$0xff]  ;;  %v523_v40 = vld [vmem:[#allocation11 + $0xb80] sm:$0xff] }
 0x1e5   :  { %v2412_v6 = vpack.c.bf16 %v530_v37, %v526_v36  ;;  %v2158_v48 = vpack.c.bf16 %v527_v41, %v523_v40  ;;  %v561_v36 = vld [vmem:[#allocation11 + $0xcb0] sm:$0xff]  ;;  %v564_v37 = vld [vmem:[#allocation11 + $0xcc8] sm:$0xff] }
 0x1e6   :  { %2139 = vmatpush1.bf16.msra.mxu0 %v2138_v45  ;;  %v536_v45 = vld [vmem:[#allocation11 + $0xbe8] sm:$0xff]  ;;  %v2430_v41 = vpack.c.bf16 %v561_v36, %v557_v34  ;;  %v599_v34 = vld [vmem:[#allocation11 + $0xde0] sm:$0xff] }
 0x1e7   :  { %2395 = vmatpush1.bf16.msra.mxu1 %v2394_v46  ;;  %2141 = vmatprep.subr.bf16.mxu0 %v2140_v47  ;;  %v534_v46 = vld [vmem:[#allocation11 + $0xbd8] sm:$0xff]  ;;  %v2160_v50 = vpack.c.bf16 %v536_v45, %v532_v44  ;;  %v565_v44 = vld [vmem:[#allocation11 + $0xcd0] sm:$0xff] }
 0x1e8   :  { %2397 = vmatprep.subr.bf16.mxu1 %v2396_v51  ;;  %v538_v47 = vld [vmem:[#allocation11 + $0xbf8] sm:$0xff]  ;;  %v531_v51 = vld [vmem:[#allocation11 + $0xbc0] sm:$0xff] }
 0x1e9   :  { %v2416_v56 = vpack.c.bf16 %v538_v47, %v534_v46  ;;  %v2162_v4 = vpack.c.bf16 %v535_v52, %v531_v51  ;;  %v569_v46 = vld [vmem:[#allocation11 + $0xcf0] sm:$0xff]  ;;  %v572_v47 = vld [vmem:[#allocation11 + $0xd08] sm:$0xff] }
 0x1ea   :  { %2143 = vmatpush1.bf16.msra.mxu0 %v2142_v61  ;;  %v544_v61 = vld [vmem:[#allocation11 + $0xc28] sm:$0xff]  ;;  %v2434_v52 = vpack.c.bf16 %v569_v46, %v565_v44  ;;  %v607_v44 = vld [vmem:[#allocation11 + $0xe20] sm:$0xff] }
 0x1eb   :  { %2399 = vmatpush1.bf16.msra.mxu1 %v2398_v62  ;;  %2145 = vmatprep.subr.bf16.mxu0 %v2144_v63  ;;  %v542_v62 = vld [vmem:[#allocation11 + $0xc18] sm:$0xff]  ;;  %v2164_v3 = vpack.c.bf16 %v544_v61, %v540_v60  ;;  %v573_v60 = vld [vmem:[#allocation11 + $0xd10] sm:$0xff] }
 0x1ec   :  { %2401 = vmatprep.subr.bf16.mxu1 %v2400_v0  ;;  %v546_v63 = vld [vmem:[#allocation11 + $0xc38] sm:$0xff]  ;;  %v543_v0 = vld [vmem:[#allocation11 + $0xc20] sm:$0xff] }
 0x1ed   :  { %v2420_v8 = vpack.c.bf16 %v546_v63, %v542_v62  ;;  %v2166_v12 = vpack.c.bf16 %v543_v0, %v539_v5  ;;  %v577_v62 = vld [vmem:[#allocation11 + $0xd30] sm:$0xff]  ;;  %v580_v63 = vld [vmem:[#allocation11 + $0xd48] sm:$0xff] }
 0x1ee   :  { %2147 = vmatpush1.bf16.msra.mxu0 %v2146_v13  ;;  %v550_v13 = vld [vmem:[#allocation11 + $0xc58] sm:$0xff]  ;;  %v2438_v0 = vpack.c.bf16 %v577_v62, %v573_v60  ;;  %v615_v60 = vld [vmem:[#allocation11 + $0xe60] sm:$0xff] }
 0x1ef   :  { %2403 = vmatpush1.bf16.msra.mxu1 %v2402_v14  ;;  %2149 = vmatprep.subr.bf16.mxu0 %v2148_v10  ;;  %v554_v14 = vld [vmem:[#allocation11 + $0xc78] sm:$0xff]  ;;  %v2422_v10 = vpack.c.bf16 %v545_v9, %v541_v1  ;;  %v579_v1 = vld [vmem:[#allocation11 + $0xd40] sm:$0xff] }
 0x1f0   :  { %2405 = vmatprep.subr.bf16.mxu1 %v2404_v20  ;;  %v2532_v20 = vpop.eup %2531  ;;  %v2424_v25 = vpack.c.bf16 %v554_v14, %v550_v13  ;;  %v583_v9 = vld [vmem:[#allocation11 + $0xd60] sm:$0xff]  ;;  %v588_v13 = vld [vmem:[#allocation11 + $0xd88] sm:$0xff] }
 0x1f1   :  { %v592_v14 = vld [vmem:[#allocation11 + $0xda8] sm:$0xff]  ;;  %v2186_v17 = vpack.c.bf16 %v583_v9, %v579_v1  ;;  %v619_v9 = vld [vmem:[#allocation11 + $0xe80] sm:$0xff] }
 0x1f2   :  { %2151 = vmatpush1.bf16.msra.mxu0 %v2150_v26  ;;  %v558_v26 = vld [vmem:[#allocation11 + $0xc98] sm:$0xff] }
 0x1f3   :  { %2407 = vmatpush1.bf16.msra.mxu1 %v2406_v27  ;;  %2153 = vmatprep.subr.bf16.mxu0 %v2152_v28  ;;  %v562_v27 = vld [vmem:[#allocation11 + $0xcb8] sm:$0xff]  ;;  %v2534_v28 = vpop.eup %2533 }
 0x1f4   :  { %2409 = vmatprep.subr.bf16.mxu1 %v2408_v32  ;;  %v555_v32 = vld [vmem:[#allocation11 + $0xc80] sm:$0xff]  ;;  %v2428_v35 = vpack.c.bf16 %v562_v27, %v558_v26  ;;  %v596_v26 = vld [vmem:[#allocation11 + $0xdc8] sm:$0xff]  ;;  %v2536_v19 = vpop.eup %2535 }
 0x1f5   :  { %v2174_v40 = vpack.c.bf16 %v559_v33, %v555_v32  ;;  %v600_v27 = vld [vmem:[#allocation11 + $0xde8] sm:$0xff]  ;;  %v595_v33 = vld [vmem:[#allocation11 + $0xdc0] sm:$0xff] }
 0x1f6   :  { %2155 = vmatpush1.bf16.msra.mxu0 %v2154_v38  ;;  %v568_v38 = vld [vmem:[#allocation11 + $0xce8] sm:$0xff]  ;;  %v2192_v32 = vpack.c.bf16 %v600_v27, %v596_v26  ;;  %v633_v26 = vld [vmem:[#allocation11 + $0xef0] sm:$0xff] }
 0x1f7   :  { %2411 = vmatpush1.bf16.msra.mxu1 %v2410_v7  ;;  %2157 = vmatprep.subr.bf16.mxu0 %v2156_v39  ;;  %v566_v7 = vld [vmem:[#allocation11 + $0xcd8] sm:$0xff]  ;;  %v2176_v42 = vpack.c.bf16 %v568_v38, %v564_v37  ;;  %v601_v37 = vld [vmem:[#allocation11 + $0xdf0] sm:$0xff]  ;;  %v604_v38 = vld [vmem:[#allocation11 + $0xe08] sm:$0xff] }
 0x1f8   :  { %2413 = vmatprep.subr.bf16.mxu1 %v2412_v6  ;;  %v570_v39 = vld [vmem:[#allocation11 + $0xcf8] sm:$0xff]  ;;  %v563_v6 = vld [vmem:[#allocation11 + $0xcc0] sm:$0xff]  ;;  %v636_v27 = vld [vmem:[#allocation11 + $0xf08] sm:$0xff] }
 0x1f9   :  { %v2432_v45 = vpack.c.bf16 %v570_v39, %v566_v7  ;;  %v2178_v51 = vpack.c.bf16 %v567_v43, %v563_v6  ;;  %v608_v7 = vld [vmem:[#allocation11 + $0xe28] sm:$0xff]  ;;  %v606_v39 = vld [vmem:[#allocation11 + $0xe18] sm:$0xff]  ;;  %v603_v43 = vld [vmem:[#allocation11 + $0xe00] sm:$0xff] }
 0x1fa   :  { %2159 = vmatpush1.bf16.msra.mxu0 %v2158_v48  ;;  %v576_v48 = vld [vmem:[#allocation11 + $0xd28] sm:$0xff]  ;;  %v2196_v6 = vpack.c.bf16 %v608_v7, %v604_v38  ;;  %v641_v38 = vld [vmem:[#allocation11 + $0xf30] sm:$0xff] }
 0x1fb   :  { %2415 = vmatpush1.bf16.msra.mxu1 %v2414_v49  ;;  %2161 = vmatprep.subr.bf16.mxu0 %v2160_v50  ;;  %v574_v49 = vld [vmem:[#allocation11 + $0xd18] sm:$0xff]  ;;  %v2180_v55 = vpack.c.bf16 %v576_v48, %v572_v47  ;;  %v609_v47 = vld [vmem:[#allocation11 + $0xe30] sm:$0xff]  ;;  %v612_v48 = vld [vmem:[#allocation11 + $0xe48] sm:$0xff] }
 0x1fc   :  { %2417 = vmatprep.subr.bf16.mxu1 %v2416_v56  ;;  %v578_v50 = vld [vmem:[#allocation11 + $0xd38] sm:$0xff]  ;;  %v571_v56 = vld [vmem:[#allocation11 + $0xd00] sm:$0xff]  ;;  %v644_v7 = vld [vmem:[#allocation11 + $0xf48] sm:$0xff] }
 0x1fd   :  { %v2436_v61 = vpack.c.bf16 %v578_v50, %v574_v49  ;;  %v2182_v5 = vpack.c.bf16 %v575_v58, %v571_v56  ;;  %v616_v49 = vld [vmem:[#allocation11 + $0xe68] sm:$0xff]  ;;  %v614_v50 = vld [vmem:[#allocation11 + $0xe58] sm:$0xff]  ;;  %v611_v58 = vld [vmem:[#allocation11 + $0xe40] sm:$0xff] }
 0x1fe   :  { %2163 = vmatpush1.bf16.msra.mxu0 %v2162_v4  ;;  %v584_v4 = vld [vmem:[#allocation11 + $0xd68] sm:$0xff]  ;;  %v2200_v56 = vpack.c.bf16 %v616_v49, %v612_v48  ;;  %v649_v48 = vld [vmem:[#allocation11 + $0xf70] sm:$0xff] }
 0x1ff   :  { %2419 = vmatpush1.bf16.msra.mxu1 %v2418_v2  ;;  %2165 = vmatprep.subr.bf16.mxu0 %v2164_v3  ;;  %v582_v2 = vld [vmem:[#allocation11 + $0xd58] sm:$0xff]  ;;  %v652_v49 = vld [vmem:[#allocation11 + $0xf88] sm:$0xff] }
 0x200   :  { %2421 = vmatprep.subr.bf16.mxu1 %v2420_v8  ;;  %v586_v3 = vld [vmem:[#allocation11 + $0xd78] sm:$0xff]  ;;  %v2184_v8 = vpack.c.bf16 %v584_v4, %v580_v63  ;;  %v617_v63 = vld [vmem:[#allocation11 + $0xe70] sm:$0xff]  ;;  %v620_v4 = vld [vmem:[#allocation11 + $0xe88] sm:$0xff] }
 0x201   :  { %1532 = vmatmul.mubr.f32.vlgmr.msra.gmra.mrb[4].mxu0 %v2532_v20  ;;  %v2440_v11 = vpack.c.bf16 %v586_v3, %v582_v2  ;;  %v624_v2 = vld [vmem:[#allocation11 + $0xea8] sm:$0xff]  ;;  %v622_v3 = vld [vmem:[#allocation11 + $0xe98] sm:$0xff] }
 0x202   :  { %1816 = vmatmul.mubr.f32.vlgmr.msra.gmra.mrb[4].mxu1 %v2532_v20  ;;  %2167 = vmatpush1.bf16.msra.mxu0 %v2166_v12  ;;  %v585_v12 = vld [vmem:[#allocation11 + $0xd70] sm:$0xff]  ;;  %v2188_v20 = vpack.c.bf16 %v592_v14, %v588_v13  ;;  %v2204_v1 = vpack.c.bf16 %v624_v2, %v620_v4  ;;  %v628_v14 = vld [vmem:[#allocation11 + $0xec8] sm:$0xff] }
 0x203   :  { %1602 = vmatprep.mubr.f32.mxu0 %v2534_v28  ;;  %2423 = vmatpush1.bf16.msra.mxu1 %v2422_v10  ;;  %v590_v10 = vld [vmem:[#allocation11 + $0xd98] sm:$0xff]  ;;  %v2442_v16 = vpack.c.bf16 %v585_v12, %v581_v18  ;;  %v623_v18 = vld [vmem:[#allocation11 + $0xea0] sm:$0xff]  ;;  %v625_v13 = vld [vmem:[#allocation11 + $0xeb0] sm:$0xff] }
 0x204   :  { %1886 = vmatprep.mubr.f32.mxu1 %v2534_v28  ;;  %2169 = vmatprep.subr.bf16.mxu0 %v2168_v21  ;;  %v587_v21 = vld [vmem:[#allocation11 + $0xd80] sm:$0xff]  ;;  %v2444_v24 = vpack.c.bf16 %v594_v15, %v590_v10  ;;  %v598_v28 = vld [vmem:[#allocation11 + $0xdd8] sm:$0xff]  ;;  %v632_v10 = vld [vmem:[#allocation11 + $0xee8] sm:$0xff] }
 0x205   :  { %2425 = vmatprep.subr.bf16.mxu1 %v2424_v25  ;;  %v593_v25 = vld [vmem:[#allocation11 + $0xdb0] sm:$0xff]  ;;  %v630_v15 = vld [vmem:[#allocation11 + $0xed8] sm:$0xff]  ;;  %v660_v2 = vld [vmem:[#allocation11 + $0xfc8] sm:$0xff] }
 0x206   :  { %2171 = vmatpush1.bf16.msra.mxu0 %v2170_v29  ;;  %v602_v29 = vld [vmem:[#allocation11 + $0xdf8] sm:$0xff]  ;;  %v657_v4 = vld [vmem:[#allocation11 + $0xfb0] sm:$0xff] }
 0x207   :  { %2427 = vmatpush1.bf16.msra.mxu1 %v2426_v30  ;;  %2173 = vmatprep.subr.bf16.mxu0 %v2172_v31  ;;  %v2190_v30 = vpack.c.bf16 %v591_v22, %v587_v21  ;;  %v2446_v31 = vpack.c.bf16 %v593_v25, %v589_v23  ;;  %v2448_v36 = vpack.c.bf16 %v602_v29, %v598_v28  ;;  %v627_v22 = vld [vmem:[#allocation11 + $0xec0] sm:$0xff]  ;;  %v640_v28 = vld [vmem:[#allocation11 + $0xf28] sm:$0xff]  ;;  %v638_v29 = vld [vmem:[#allocation11 + $0xf18] sm:$0xff] }
 0x208   :  { %2429 = vmatprep.subr.bf16.mxu1 %v2428_v35  ;;  %v597_v35 = vld [vmem:[#allocation11 + $0xdd0] sm:$0xff]  ;;  %v2208_v21 = vpack.c.bf16 %v632_v10, %v628_v14  ;;  %v631_v23 = vld [vmem:[#allocation11 + $0xee0] sm:$0xff] }
 0x209   :  { %v665_v14 = vld [vmem:[#allocation11 + $0xff0] sm:$0xff] }
 0x20a   :  { %2175 = vmatpush1.bf16.msra.mxu0 %v2174_v40  ;;  %v610_v40 = vld [vmem:[#allocation11 + $0xe38] sm:$0xff] }
 0x20b   :  { %2431 = vmatpush1.bf16.msra.mxu1 %v2430_v41  ;;  %2177 = vmatprep.subr.bf16.mxu0 %v2176_v42  ;;  %v2194_v41 = vpack.c.bf16 %v599_v34, %v595_v33  ;;  %v2450_v42 = vpack.c.bf16 %v601_v37, %v597_v35  ;;  %v2452_v46 = vpack.c.bf16 %v610_v40, %v606_v39  ;;  %v635_v34 = vld [vmem:[#allocation11 + $0xf00] sm:$0xff]  ;;  %v648_v39 = vld [vmem:[#allocation11 + $0xf68] sm:$0xff]  ;;  %v646_v40 = vld [vmem:[#allocation11 + $0xf58] sm:$0xff] }
 0x20c   :  { %2433 = vmatprep.subr.bf16.mxu1 %v2432_v45  ;;  %v605_v45 = vld [vmem:[#allocation11 + $0xe10] sm:$0xff]  ;;  %v2212_v33 = vpack.c.bf16 %v640_v28, %v636_v27  ;;  %v639_v35 = vld [vmem:[#allocation11 + $0xf20] sm:$0xff] }
 0x20e   :  { %2179 = vmatpush1.bf16.msra.mxu0 %v2178_v51  ;;  %v618_v51 = vld [vmem:[#allocation11 + $0xe78] sm:$0xff] }
 0x20f   :  { %2435 = vmatpush1.bf16.msra.mxu1 %v2434_v52  ;;  %2181 = vmatprep.subr.bf16.mxu0 %v2180_v55  ;;  %v2198_v52 = vpack.c.bf16 %v607_v44, %v603_v43  ;;  %v2454_v55 = vpack.c.bf16 %v609_v47, %v605_v45  ;;  %v2456_v62 = vpack.c.bf16 %v618_v51, %v614_v50  ;;  %v643_v44 = vld [vmem:[#allocation11 + $0xf40] sm:$0xff]  ;;  %v656_v50 = vld [vmem:[#allocation11 + $0xfa8] sm:$0xff]  ;;  %v654_v51 = vld [vmem:[#allocation11 + $0xf98] sm:$0xff] }
 0x210   :  { %2437 = vmatprep.subr.bf16.mxu1 %v2436_v61  ;;  %v613_v61 = vld [vmem:[#allocation11 + $0xe50] sm:$0xff]  ;;  %v2216_v43 = vpack.c.bf16 %v648_v39, %v644_v7  ;;  %v647_v45 = vld [vmem:[#allocation11 + $0xf60] sm:$0xff] }
 0x212   :  { %2183 = vmatpush1.bf16.msra.mxu0 %v2182_v5  ;;  %v626_v5 = vld [vmem:[#allocation11 + $0xeb8] sm:$0xff] }
 0x213   :  { %2439 = vmatpush1.bf16.msra.mxu1 %v2438_v0  ;;  %2185 = vmatprep.subr.bf16.mxu0 %v2184_v8  ;;  %v2202_v0 = vpack.c.bf16 %v615_v60, %v611_v58  ;;  %v2458_v8 = vpack.c.bf16 %v617_v63, %v613_v61  ;;  %v2460_v12 = vpack.c.bf16 %v626_v5, %v622_v3  ;;  %v651_v60 = vld [vmem:[#allocation11 + $0xf80] sm:$0xff]  ;;  %v664_v3 = vld [vmem:[#allocation11 + $0xfe8] sm:$0xff]  ;;  %v662_v5 = vld [vmem:[#allocation11 + $0xfd8] sm:$0xff] }
 0x214   :  { %2441 = vmatprep.subr.bf16.mxu1 %v2440_v11  ;;  %v621_v11 = vld [vmem:[#allocation11 + $0xe90] sm:$0xff]  ;;  %v2220_v58 = vpack.c.bf16 %v656_v50, %v652_v49  ;;  %v655_v61 = vld [vmem:[#allocation11 + $0xfa0] sm:$0xff] }
 0x216   :  { %2187 = vmatpush1.bf16.msra.mxu0 %v2186_v17  ;;  %v634_v17 = vld [vmem:[#allocation11 + $0xef8] sm:$0xff] }
 0x217   :  { %2443 = vmatpush1.bf16.msra.mxu1 %v2442_v16  ;;  %2189 = vmatprep.subr.bf16.mxu0 %v2188_v20  ;;  %v2206_v16 = vpack.c.bf16 %v623_v18, %v619_v9  ;;  %v2462_v20 = vpack.c.bf16 %v625_v13, %v621_v11  ;;  %v2464_v25 = vpack.c.bf16 %v634_v17, %v630_v15  ;;  %v659_v18 = vld [vmem:[#allocation11 + $0xfc0] sm:$0xff]  ;;  %v661_v13 = vld [vmem:[#allocation11 + $0xfd0] sm:$0xff] }
 0x218   :  { %2445 = vmatprep.subr.bf16.mxu1 %v2444_v24  ;;  %v629_v24 = vld [vmem:[#allocation11 + $0xed0] sm:$0xff]  ;;  %v2224_v9 = vpack.c.bf16 %v664_v3, %v660_v2  ;;  %v663_v11 = vld [vmem:[#allocation11 + $0xfe0] sm:$0xff]  ;;  %v2482_v15 = vpack.c.bf16 %v665_v14, %v661_v13 }
 0x219   :  { %v2226_v10 = vpack.c.bf16 %v663_v11, %v659_v18  ;;  %v1303_v17 = vld [vmem:[#allocation13] sm:$0xf] }
 0x21a   :  { %2191 = vmatpush1.bf16.msra.mxu0 %v2190_v30  ;;  %v642_v30 = vld [vmem:[#allocation11 + $0xf38] sm:$0xff] }
 0x21b   :  { %2447 = vmatpush1.bf16.msra.mxu1 %v2446_v31  ;;  %2193 = vmatprep.subr.bf16.mxu0 %v2192_v32  ;;  %v2210_v31 = vpack.c.bf16 %v631_v23, %v627_v22  ;;  %v2466_v32 = vpack.c.bf16 %v633_v26, %v629_v24  ;;  %v2468_v37 = vpack.c.bf16 %v642_v30, %v638_v29 }
 0x21c   :  { %2449 = vmatprep.subr.bf16.mxu1 %v2448_v36  ;;  %v637_v36 = vld [vmem:[#allocation11 + $0xf10] sm:$0xff]  ;;  %v1320_v22 = vrot.slane %v1303_v17, %v2945_v59 }
 0x21e   :  { %2195 = vmatpush1.bf16.msra.mxu0 %v2194_v41  ;;  %v650_v41 = vld [vmem:[#allocation11 + $0xf78] sm:$0xff] }
 0x21f   :  { %2451 = vmatpush1.bf16.msra.mxu1 %v2450_v42  ;;  %2197 = vmatprep.subr.bf16.mxu0 %v2196_v6  ;;  %v2214_v42 = vpack.c.bf16 %v639_v35, %v635_v34  ;;  %v2470_v6 = vpack.c.bf16 %v641_v38, %v637_v36  ;;  %v2472_v47 = vpack.c.bf16 %v650_v41, %v646_v40 }
 0x220   :  { %2453 = vmatprep.subr.bf16.mxu1 %v2452_v46  ;;  %v645_v46 = vld [vmem:[#allocation11 + $0xf50] sm:$0xff] }
 0x222   :  { %2199 = vmatpush1.bf16.msra.mxu0 %v2198_v52  ;;  %v658_v52 = vld [vmem:[#allocation11 + $0xfb8] sm:$0xff] }
 0x223   :  { %2455 = vmatpush1.bf16.msra.mxu1 %v2454_v55  ;;  %2201 = vmatprep.subr.bf16.mxu0 %v2200_v56  ;;  %v2218_v55 = vpack.c.bf16 %v647_v45, %v643_v44  ;;  %v2474_v56 = vpack.c.bf16 %v649_v48, %v645_v46  ;;  %v2476_v63 = vpack.c.bf16 %v658_v52, %v654_v51  ;;  %v1955_v45 = vld [vmem:[#allocation2] ss:$0 sm:$0xff] }
 0x224   :  { %2457 = vmatprep.subr.bf16.mxu1 %v2456_v62  ;;  %v653_v62 = vld [vmem:[#allocation11 + $0xf90] sm:$0xff] }
 0x226   :  { %2203 = vmatpush1.bf16.msra.mxu0 %v2202_v0  ;;  %v666_v0 = vld [vmem:[#allocation11 + $0xff8] sm:$0xff] }
 0x227   :  { %2459 = vmatpush1.bf16.msra.mxu1 %v2458_v8  ;;  %2205 = vmatprep.subr.bf16.mxu0 %v2204_v1  ;;  %v2222_v8 = vpack.c.bf16 %v655_v61, %v651_v60  ;;  %v2478_v1 = vpack.c.bf16 %v657_v4, %v653_v62 }
 0x228   :  { %2461 = vmatprep.subr.bf16.mxu1 %v2460_v12  ;;  %v2480_v12 = vpack.c.bf16 %v666_v0, %v662_v5 }
 0x22a   :  { %2207 = vmatpush1.bf16.msra.mxu0 %v2206_v16  ;;  %v1308_v16 = vrot.slane %v1303_v17, %v2932_v53 }
 0x22b   :  { %2463 = vmatpush1.bf16.msra.mxu1 %v2462_v20  ;;  %2209 = vmatprep.subr.bf16.mxu0 %v2208_v21  ;;  %v1316_v20 = vrot.slane %v1303_v17, %v2942_v57  ;;  %v1312_v21 = vrot.slane %v1303_v17, %v2935_v54 }
 0x22c   :  { %2465 = vmatprep.subr.bf16.mxu1 %v2464_v25 }
 0x22e   :  { %2211 = vmatpush1.bf16.msra.mxu0 %v2210_v31  ;;  %v1897_v31 = vld [vmem:[#allocation14] sm:$0xf] }
 0x22f   :  { %2467 = vmatpush1.bf16.msra.mxu1 %v2466_v32  ;;  %2213 = vmatprep.subr.bf16.mxu0 %v2212_v33  ;;  %v1902_v32 = vrot.slane %v1897_v31, %v2932_v53  ;;  %v1906_v33 = vrot.slane %v1897_v31, %v2935_v54  ;;  %v1910_v36 = vrot.slane %v1897_v31, %v2942_v57 }
 0x230   :  { %2469 = vmatprep.subr.bf16.mxu1 %v2468_v37  ;;  %v1914_v7 = vrot.slane %v1897_v31, %v2945_v59 }
 0x232   :  { %2215 = vmatpush1.bf16.msra.mxu0 %v2214_v42 }
 0x233   :  { %2471 = vmatpush1.bf16.msra.mxu1 %v2470_v6  ;;  %2217 = vmatprep.subr.bf16.mxu0 %v2216_v43 }
 0x234   :  { %2473 = vmatprep.subr.bf16.mxu1 %v2472_v47 }
 0x236   :  { %2219 = vmatpush1.bf16.msra.mxu0 %v2218_v55 }
 0x237   :  { %2475 = vmatpush1.bf16.msra.mxu1 %v2474_v56  ;;  %2221 = vmatprep.subr.bf16.mxu0 %v2220_v58 }
 0x238   :  { %2477 = vmatprep.subr.bf16.mxu1 %v2476_v63 }
 0x23a   :  { %2223 = vmatpush1.bf16.msra.mxu0 %v2222_v8 }
 0x23b   :  { %2479 = vmatpush1.bf16.msra.mxu1 %v2478_v1  ;;  %2225 = vmatprep.subr.bf16.mxu0 %v2224_v9 }
 0x23c   :  { %2481 = vmatprep.subr.bf16.mxu1 %v2480_v12 }
 0x23e   :  { %2227 = vmatpush1.bf16.msra.mxu0 %v2226_v10 }
 0x23f   :  { %2483 = vmatpush1.bf16.msra.mxu1 %v2482_v15 }
 0x241   :  { %1603 = vmatmul.mubr.f32.vlgmr.msra.gmra.mrb[4].mxu0 %v2536_v19 }
 0x242   :  { %1887 = vmatmul.mubr.f32.vlgmr.msra.gmra.mrb[4].mxu1 %v2536_v19 }
 0x314   :  { %v1604_v23 = vpop.f32.mrb[4].mxu0 }
 0x315   :  { %v2484_v24 = vadd.f32 %v1604_v23, %v1308_v16  ;;  %v1888_v25 = vpop.f32.mrb[4].mxu1  ;;  %v1606_v26 = vpop.f32.mrb[5].mxu0 }
 0x316   :  { %v2486_v27 = vadd.f32 %v1888_v25, %v1316_v20  ;;  %v2485_v28 = vadd.f32 %v1606_v26, %v1312_v21  ;;  %v1890_v29 = vpop.f32.mrb[5].mxu1 }
 0x317   :  { %2537 = vtanh.f32 %v2484_v24  ;;  %v2487_v30 = vadd.f32 %v1890_v29, %v1320_v22 }
 0x318   :  { %2539 = vtanh.f32 %v2486_v27 }
 0x319   :  { %2541 = vtanh.f32 %v2485_v28 }
 0x31a   :  { %2543 = vtanh.f32 %v2487_v30 }
 0x321   :  { %v2538_v34 = vpop.eup %2537 }
 0x322   :  { %v2540_v35 = vpop.eup %2539  ;;  %v1919_v37 = vmul.f32 %v2538_v34, %v1902_v32 }
 0x323   :  { %v2542_v38 = vpop.eup %2541  ;;  %v1921_v41 = vmul.f32 %v2540_v35, %v1910_v36 }
 0x324   :  { %v1920_v39 = vmul.f32 %v2542_v38, %v1906_v33  ;;  %v2544_v40 = vpop.eup %2543 }
 0x325   :  { %v1922_v6 = vmul.f32 %v2544_v40, %v1914_v7 }
 0x326   :  { %v1923_v42 = vadd.f32 %v1920_v39, %v1919_v37 }
 0x328   :  { %v1924_v43 = vadd.f32 %v1923_v42, %v1921_v41 }
 0x32a   :  { %v1925_v44 = vadd.f32 %v1924_v43, %v1922_v6 }
 0x32c   :  { %1926 = vadd.xlane.f32.xlu0 %v1925_v44 }
 0x3b9   :  { %v1927_v53 = vpop.xlane.xlu0 %1926 }
 0x3ba   :  { %v1935_v54 = vadd.f32 %v1955_v45, %v1927_v53 }
 0x3bc   :  { %1937 = vst.msk [vmem:[%s2988_s9] sm:$0xff] %vm1936_vm2, %v1935_v54 }
 0x3bd   :  { %1942 = vsyncpa [#allocation4], 1 }
 0x3be   :  { %1943 = vsyncpa [#allocation6], 1 }
 0x3bf   :  { %1944 = vsyncpa [#allocation9], 1 }
 0x3c0   :  { %1945 = vsyncpa [#allocation12], 1 }
 0x3c1   :  { %1946 = vsyncpa [#allocation15], 1 }

</bundles_post_ra>
